<compile_context>
chip_gen: v7x
topology: tpu7x:2x2x1
jax: 0.10.0
libtpu: 0.0.40
codegen_flags: <defaults>
</compile_context>

<pallas_src>
import jax
import jax.numpy as jnp
from jax.experimental import pallas as pl
from jax.experimental.pallas import tpu as pltpu


# ----------------------------------------------------------------------------
# Fused residual-block kernel (one image per grid step)
# ----------------------------------------------------------------------------
def _residual_block_kernel(x_ref, s1_ref, t1_ref, w1_ref, b1_ref,
                           s2_ref, t2_ref, w2_ref, b2_ref,
                           o_ref, hpad_ref, acc_ref):
    """x_ref:(1,H,W,C) f32; w1_ref:(9,C,C) bf16 (tap=3*di+dj, [cin,cout]);
    w2_ref:(C,C) bf16; s*/t*/b*:(1,C) f32; o_ref:(1,H,W,C) f32;
    hpad_ref:(H+2,W+2,C) f32 scratch; acc_ref:(H*W,C) f32 scratch."""
    _, H, W, C = x_ref.shape

    x = x_ref[0]                                              # (H, W, C) f32

    # ---- BN1 (folded) + ReLU, written into a zero-padded VMEM buffer -------
    hpad_ref[...] = jnp.zeros_like(hpad_ref)
    h1 = jnp.maximum(x * s1_ref[...] + t1_ref[...], 0.0)
    hpad_ref[pl.ds(1, H), pl.ds(1, W), :] = h1

    # ---- 3x3 conv: 9 shifted (H*W,C) @ (C,C) bf16 MXU dots, f32 accumulate --
    acc_ref[...] = jnp.zeros_like(acc_ref)
    for tap in range(9):
        di, dj = tap // 3, tap % 3
        win = hpad_ref[pl.ds(di, H), pl.ds(dj, W), :]
        win = win.reshape(H * W, C).astype(jnp.bfloat16)
        acc_ref[...] += jnp.dot(win, w1_ref[tap],
                                preferred_element_type=jnp.float32)
    h2 = acc_ref[...] + b1_ref[...]                           # conv1 bias (f32)

    # ---- BN2 (folded) + ReLU fused into the 1x1-conv prologue ---------------
    h2 = jnp.maximum(h2 * s2_ref[...] + t2_ref[...], 0.0).astype(jnp.bfloat16)

    # ---- 1x1 conv + bias + residual add (f32 epilogue) ----------------------
    y = jnp.dot(h2, w2_ref[...], preferred_element_type=jnp.float32)
    y = y + b2_ref[...] + x.reshape(H * W, C)
    o_ref[...] = y.reshape(1, H, W, C).astype(o_ref.dtype)


def residual_block(x_nchw, params):
    """PyTorch-convention input (B, C, H, W) -> (B, C, H, W)."""
    B, C, H, W = x_nchw.shape
    x = jnp.transpose(x_nchw, (0, 2, 3, 1)).astype(jnp.float32)   # NHWC

    w1 = params["w1"].astype(jnp.bfloat16)        # (9, C, C)
    w2 = params["w2"].astype(jnp.bfloat16)        # (C, C)

    vec_spec = pl.BlockSpec((1, C), lambda b: (0, 0))
    out = pl.pallas_call(
        _residual_block_kernel,
        out_shape=jax.ShapeDtypeStruct((B, H, W, C), jnp.float32),
        grid_spec=pltpu.PrefetchScalarGridSpec(
            num_scalar_prefetch=0,
            grid=(B,),
            in_specs=[
                pl.BlockSpec((1, H, W, C), lambda b: (b, 0, 0, 0)),  # x
                vec_spec,                                            # bn1 scale
                vec_spec,                                            # bn1 shift
                pl.BlockSpec((9, C, C), lambda b: (0, 0, 0)),        # w1 (3x3)
                vec_spec,                                            # b1
                vec_spec,                                            # bn2 scale
                vec_spec,                                            # bn2 shift
                pl.BlockSpec((C, C), lambda b: (0, 0)),              # w2 (1x1)
                vec_spec,                                            # b2
            ],
            out_specs=pl.BlockSpec((1, H, W, C), lambda b: (b, 0, 0, 0)),
            scratch_shapes=[
                pltpu.VMEM((H + 2, W + 2, C), jnp.float32),   # padded BN1+ReLU
                pltpu.VMEM((H * W, C), jnp.float32),          # conv1 accumulator
            ],
        ),
        compiler_params=pltpu.CompilerParams(
            dimension_semantics=("parallel",),
            vmem_limit_bytes=32 * 1024 * 1024,
        ),
    )(x, params["bn1_s"], params["bn1_t"], w1, params["b1"],
      params["bn2_s"], params["bn2_t"], w2, params["b2"])

    return jnp.transpose(out, (0, 3, 1, 2))


# ----------------------------------------------------------------------------
# Pure-JAX reference (same math, f32) for a correctness check
# ----------------------------------------------------------------------------
def residual_block_ref(x_nchw, params):
    B, C, H, W = x_nchw.shape
    x = jnp.transpose(x_nchw, (0, 2, 3, 1)).astype(jnp.float32)
    h = jnp.maximum(x * params["bn1_s"][0] + params["bn1_t"][0], 0.0)
    w1_hwio = params["w1"].reshape(3, 3, C, C)
    h = jax.lax.conv_general_dilated(
        h, w1_hwio, window_strides=(1, 1), padding="SAME",
        dimension_numbers=("NHWC", "HWIO", "NHWC"),
        precision=jax.lax.Precision.HIGHEST) + params["b1"][0]
    h = jnp.maximum(h * params["bn2_s"][0] + params["bn2_t"][0], 0.0)
    h = jnp.einsum("bhwc,cd->bhwd", h, params["w2"],
                   precision=jax.lax.Precision.HIGHEST) + params["b2"][0]
    out = x + h
    return jnp.transpose(out, (0, 3, 1, 2))


# ----------------------------------------------------------------------------
# Deterministic synthetic parameters
# ----------------------------------------------------------------------------
def init_params(key, dim, eps=1e-5):
    ks = jax.random.split(key, 6)

    def bn(k):
        k1, k2, k3, k4 = jax.random.split(k, 4)
        gamma = jax.random.uniform(k1, (1, dim), jnp.float32, 0.5, 1.5)
        beta = 0.1 * jax.random.normal(k2, (1, dim), jnp.float32)
        mean = 0.1 * jax.random.normal(k3, (1, dim), jnp.float32)
        var = jax.random.uniform(k4, (1, dim), jnp.float32, 0.5, 1.5)
        scale = gamma / jnp.sqrt(var + eps)
        return scale, beta - mean * scale

    p = {}
    p["bn1_s"], p["bn1_t"] = bn(ks[0])
    w1 = jax.random.normal(ks[1], (3, 3, dim, dim), jnp.float32) / jnp.sqrt(9 * dim)
    p["w1"] = w1.reshape(9, dim, dim)            # tap-major, (cin, cout)
    p["b1"] = 0.01 * jax.random.normal(ks[2], (1, dim), jnp.float32)
    p["bn2_s"], p["bn2_t"] = bn(ks[3])
    p["w2"] = jax.random.normal(ks[4], (dim, dim), jnp.float32) / jnp.sqrt(dim)
    p["b2"] = 0.01 * jax.random.normal(ks[5], (1, dim), jnp.float32)
    return p


# ----------------------------------------------------------------------------
if __name__ == "__main__":
    key = jax.random.PRNGKey(0)
    k_param, k_x = jax.random.split(key)

    B, C, H, W = 2, 128, 16, 16          # dim=128: lane-aligned, still small
    params = init_params(k_param, C)
    x = jax.random.normal(k_x, (B, C, H, W), jnp.float32)

    out = jax.jit(lambda a: residual_block(a, params))(x)
    jax.block_until_ready(out)

    assert out.shape == (B, C, H, W)
    assert out.dtype == jnp.float32

    ref = residual_block_ref(x, params)
    max_err = float(jnp.max(jnp.abs(out - ref)))
    assert max_err < 0.25, f"max abs err vs f32 reference: {max_err}"

    print("KERNEL_OK")
</pallas_src>

<mosaic_0001>
module attributes {stable_mosaic.version = 11 : i64} {
  func.func @_residual_block_kernel(%arg0: i32, %arg1: memref<1x16x16x128xf32, #tpu.memory_space<vmem>>, %arg2: memref<1x128xf32, #tpu.memory_space<vmem>>, %arg3: memref<1x128xf32, #tpu.memory_space<vmem>>, %arg4: memref<9x128x128xbf16, #tpu.memory_space<vmem>>, %arg5: memref<1x128xf32, #tpu.memory_space<vmem>>, %arg6: memref<1x128xf32, #tpu.memory_space<vmem>>, %arg7: memref<1x128xf32, #tpu.memory_space<vmem>>, %arg8: memref<128x128xbf16, #tpu.memory_space<vmem>>, %arg9: memref<1x128xf32, #tpu.memory_space<vmem>>, %arg10: memref<1x16x16x128xf32, #tpu.memory_space<vmem>>, %arg11: memref<18x18x128xf32, #tpu.memory_space<vmem>>, %arg12: memref<256x128xf32, #tpu.memory_space<vmem>>) attributes {dimension_semantics = [#tpu.dimension_semantics<parallel>], iteration_bounds = array<i64: 2>, scalar_prefetch = 0 : i64, scratch_operands = 2 : i64, tpu.core_type = #tpu.core_type<tc>, window_params = [{transform_indices = @transform_0, window_bounds = array<i64: 1, 16, 16, 128>}, {pipeline_mode = #tpu.pipeline_mode<synchronous>, transform_indices = @transform_1, window_bounds = array<i64: 1, 128>}, {pipeline_mode = #tpu.pipeline_mode<synchronous>, transform_indices = @transform_2, window_bounds = array<i64: 1, 128>}, {pipeline_mode = #tpu.pipeline_mode<synchronous>, transform_indices = @transform_3, window_bounds = array<i64: 9, 128, 128>}, {pipeline_mode = #tpu.pipeline_mode<synchronous>, transform_indices = @transform_4, window_bounds = array<i64: 1, 128>}, {pipeline_mode = #tpu.pipeline_mode<synchronous>, transform_indices = @transform_5, window_bounds = array<i64: 1, 128>}, {pipeline_mode = #tpu.pipeline_mode<synchronous>, transform_indices = @transform_6, window_bounds = array<i64: 1, 128>}, {pipeline_mode = #tpu.pipeline_mode<synchronous>, transform_indices = @transform_7, window_bounds = array<i64: 128, 128>}, {pipeline_mode = #tpu.pipeline_mode<synchronous>, transform_indices = @transform_8, window_bounds = array<i64: 1, 128>}, {transform_indices = @transform_9, window_bounds = array<i64: 1, 16, 16, 128>}]} {
    %c0 = arith.constant 0 : index
    %c0_0 = arith.constant 0 : index
    %c0_1 = arith.constant 0 : index
    %c0_2 = arith.constant 0 : index
    %0 = vector.load %arg1[%c0, %c0_0, %c0_1, %c0_2] : memref<1x16x16x128xf32, #tpu.memory_space<vmem>>, vector<1x16x16x128xf32>
    %1 = vector.shape_cast %0 : vector<1x16x16x128xf32> to vector<16x16x128xf32>
    %cst = arith.constant 0.000000e+00 : f32
    %2 = vector.broadcast %cst : f32 to vector<18x18x128xf32>
    %c0_3 = arith.constant 0 : index
    %c0_4 = arith.constant 0 : index
    %c0_5 = arith.constant 0 : index
    %3 = vector.load %arg11[%c0_3, %c0_4, %c0_5] : memref<18x18x128xf32, #tpu.memory_space<vmem>>, vector<18x18x128xf32>
    tpu.vector_store %arg11[%c0_3, %c0_4, %c0_5], %2 {strides = array<i32>} : memref<18x18x128xf32, #tpu.memory_space<vmem>>, vector<18x18x128xf32>,
    %c0_6 = arith.constant 0 : index
    %c0_7 = arith.constant 0 : index
    %4 = vector.load %arg2[%c0_6, %c0_7] : memref<1x128xf32, #tpu.memory_space<vmem>>, vector<1x128xf32>
    %5 = vector.shape_cast %4 : vector<1x128xf32> to vector<1x1x128xf32>
    %6 = vector.broadcast %5 : vector<1x1x128xf32> to vector<16x16x128xf32>
    %7 = arith.mulf %1, %6 : vector<16x16x128xf32>
    %c0_8 = arith.constant 0 : index
    %c0_9 = arith.constant 0 : index
    %8 = vector.load %arg3[%c0_8, %c0_9] : memref<1x128xf32, #tpu.memory_space<vmem>>, vector<1x128xf32>
    %9 = vector.shape_cast %8 : vector<1x128xf32> to vector<1x1x128xf32>
    %10 = vector.broadcast %9 : vector<1x1x128xf32> to vector<16x16x128xf32>
    %11 = arith.addf %7, %10 : vector<16x16x128xf32>
    %cst_10 = arith.constant 0.000000e+00 : f32
    %12 = vector.broadcast %cst_10 : f32 to vector<16x16x128xf32>
    %13 = arith.maximumf %11, %12 : vector<16x16x128xf32>
    %c1 = arith.constant 1 : index
    %c1_11 = arith.constant 1 : index
    %c0_12 = arith.constant 0 : index
    %14 = vector.load %arg11[%c1, %c1_11, %c0_12] : memref<18x18x128xf32, #tpu.memory_space<vmem>>, vector<16x16x128xf32>
    tpu.vector_store %arg11[%c1, %c1_11, %c0_12], %13 {strides = array<i32>} : memref<18x18x128xf32, #tpu.memory_space<vmem>>, vector<16x16x128xf32>,
    %cst_13 = arith.constant 0.000000e+00 : f32
    %15 = vector.broadcast %cst_13 : f32 to vector<256x128xf32>
    %c0_14 = arith.constant 0 : index
    %c0_15 = arith.constant 0 : index
    %16 = vector.load %arg12[%c0_14, %c0_15] : memref<256x128xf32, #tpu.memory_space<vmem>>, vector<256x128xf32>
    tpu.vector_store %arg12[%c0_14, %c0_15], %15 {strides = array<i32>} : memref<256x128xf32, #tpu.memory_space<vmem>>, vector<256x128xf32>,
    %c0_16 = arith.constant 0 : index
    %c0_17 = arith.constant 0 : index
    %c0_18 = arith.constant 0 : index
    %17 = vector.load %arg11[%c0_16, %c0_17, %c0_18] : memref<18x18x128xf32, #tpu.memory_space<vmem>>, vector<16x16x128xf32>
    %18 = vector.shape_cast %17 : vector<16x16x128xf32> to vector<256x128xf32>
    %19 = arith.truncf %18 : vector<256x128xf32> to vector<256x128xbf16>
    %c0_19 = arith.constant 0 : index
    %c0_20 = arith.constant 0 : index
    %20 = vector.load %arg12[%c0_19, %c0_20] : memref<256x128xf32, #tpu.memory_space<vmem>>, vector<256x128xf32>
    %c0_21 = arith.constant 0 : index
    %c0_22 = arith.constant 0 : index
    %c0_23 = arith.constant 0 : index
    %21 = vector.load %arg4[%c0_21, %c0_22, %c0_23] : memref<9x128x128xbf16, #tpu.memory_space<vmem>>, vector<1x128x128xbf16>
    %22 = vector.shape_cast %21 : vector<1x128x128xbf16> to vector<128x128xbf16>
    %cst_24 = arith.constant dense<0.000000e+00> : vector<256x128xf32>
    %23 = tpu.matmul %19, %22, %cst_24 {dimension_numbers = #tpu.dot_dimension_numbers<[1], [0], [0], [1], [0, 0, 1, 1], [], []>} : vector<256x128xbf16>, vector<128x128xbf16>, vector<256x128xf32> -> vector<256x128xf32>
    %24 = arith.addf %20, %23 : vector<256x128xf32>
    %c0_25 = arith.constant 0 : index
    %c0_26 = arith.constant 0 : index
    %25 = vector.load %arg12[%c0_25, %c0_26] : memref<256x128xf32, #tpu.memory_space<vmem>>, vector<256x128xf32>
    tpu.vector_store %arg12[%c0_25, %c0_26], %24 {strides = array<i32>} : memref<256x128xf32, #tpu.memory_space<vmem>>, vector<256x128xf32>,
    %c0_27 = arith.constant 0 : index
    %c1_28 = arith.constant 1 : index
    %c0_29 = arith.constant 0 : index
    %26 = vector.load %arg11[%c0_27, %c1_28, %c0_29] : memref<18x18x128xf32, #tpu.memory_space<vmem>>, vector<16x16x128xf32>
    %27 = vector.shape_cast %26 : vector<16x16x128xf32> to vector<256x128xf32>
    %28 = arith.truncf %27 : vector<256x128xf32> to vector<256x128xbf16>
    %c0_30 = arith.constant 0 : index
    %c0_31 = arith.constant 0 : index
    %29 = vector.load %arg12[%c0_30, %c0_31] : memref<256x128xf32, #tpu.memory_space<vmem>>, vector<256x128xf32>
    %c1_32 = arith.constant 1 : index
    %c0_33 = arith.constant 0 : index
    %c0_34 = arith.constant 0 : index
    %30 = vector.load %arg4[%c1_32, %c0_33, %c0_34] : memref<9x128x128xbf16, #tpu.memory_space<vmem>>, vector<1x128x128xbf16>
    %31 = vector.shape_cast %30 : vector<1x128x128xbf16> to vector<128x128xbf16>
    %cst_35 = arith.constant dense<0.000000e+00> : vector<256x128xf32>
    %32 = tpu.matmul %28, %31, %cst_35 {dimension_numbers = #tpu.dot_dimension_numbers<[1], [0], [0], [1], [0, 0, 1, 1], [], []>} : vector<256x128xbf16>, vector<128x128xbf16>, vector<256x128xf32> -> vector<256x128xf32>
    %33 = arith.addf %29, %32 : vector<256x128xf32>
    %c0_36 = arith.constant 0 : index
    %c0_37 = arith.constant 0 : index
    %34 = vector.load %arg12[%c0_36, %c0_37] : memref<256x128xf32, #tpu.memory_space<vmem>>, vector<256x128xf32>
    tpu.vector_store %arg12[%c0_36, %c0_37], %33 {strides = array<i32>} : memref<256x128xf32, #tpu.memory_space<vmem>>, vector<256x128xf32>,
    %c0_38 = arith.constant 0 : index
    %c2 = arith.constant 2 : index
    %c0_39 = arith.constant 0 : index
    %35 = vector.load %arg11[%c0_38, %c2, %c0_39] : memref<18x18x128xf32, #tpu.memory_space<vmem>>, vector<16x16x128xf32>
    %36 = vector.shape_cast %35 : vector<16x16x128xf32> to vector<256x128xf32>
    %37 = arith.truncf %36 : vector<256x128xf32> to vector<256x128xbf16>
    %c0_40 = arith.constant 0 : index
    %c0_41 = arith.constant 0 : index
    %38 = vector.load %arg12[%c0_40, %c0_41] : memref<256x128xf32, #tpu.memory_space<vmem>>, vector<256x128xf32>
    %c2_42 = arith.constant 2 : index
    %c0_43 = arith.constant 0 : index
    %c0_44 = arith.constant 0 : index
    %39 = vector.load %arg4[%c2_42, %c0_43, %c0_44] : memref<9x128x128xbf16, #tpu.memory_space<vmem>>, vector<1x128x128xbf16>
    %40 = vector.shape_cast %39 : vector<1x128x128xbf16> to vector<128x128xbf16>
    %cst_45 = arith.constant dense<0.000000e+00> : vector<256x128xf32>
    %41 = tpu.matmul %37, %40, %cst_45 {dimension_numbers = #tpu.dot_dimension_numbers<[1], [0], [0], [1], [0, 0, 1, 1], [], []>} : vector<256x128xbf16>, vector<128x128xbf16>, vector<256x128xf32> -> vector<256x128xf32>
    %42 = arith.addf %38, %41 : vector<256x128xf32>
    %c0_46 = arith.constant 0 : index
    %c0_47 = arith.constant 0 : index
    %43 = vector.load %arg12[%c0_46, %c0_47] : memref<256x128xf32, #tpu.memory_space<vmem>>, vector<256x128xf32>
    tpu.vector_store %arg12[%c0_46, %c0_47], %42 {strides = array<i32>} : memref<256x128xf32, #tpu.memory_space<vmem>>, vector<256x128xf32>,
    %c1_48 = arith.constant 1 : index
    %c0_49 = arith.constant 0 : index
    %c0_50 = arith.constant 0 : index
    %44 = vector.load %arg11[%c1_48, %c0_49, %c0_50] : memref<18x18x128xf32, #tpu.memory_space<vmem>>, vector<16x16x128xf32>
    %45 = vector.shape_cast %44 : vector<16x16x128xf32> to vector<256x128xf32>
    %46 = arith.truncf %45 : vector<256x128xf32> to vector<256x128xbf16>
    %c0_51 = arith.constant 0 : index
    %c0_52 = arith.constant 0 : index
    %47 = vector.load %arg12[%c0_51, %c0_52] : memref<256x128xf32, #tpu.memory_space<vmem>>, vector<256x128xf32>
    %c3 = arith.constant 3 : index
    %c0_53 = arith.constant 0 : index
    %c0_54 = arith.constant 0 : index
    %48 = vector.load %arg4[%c3, %c0_53, %c0_54] : memref<9x128x128xbf16, #tpu.memory_space<vmem>>, vector<1x128x128xbf16>
    %49 = vector.shape_cast %48 : vector<1x128x128xbf16> to vector<128x128xbf16>
    %cst_55 = arith.constant dense<0.000000e+00> : vector<256x128xf32>
    %50 = tpu.matmul %46, %49, %cst_55 {dimension_numbers = #tpu.dot_dimension_numbers<[1], [0], [0], [1], [0, 0, 1, 1], [], []>} : vector<256x128xbf16>, vector<128x128xbf16>, vector<256x128xf32> -> vector<256x128xf32>
    %51 = arith.addf %47, %50 : vector<256x128xf32>
    %c0_56 = arith.constant 0 : index
    %c0_57 = arith.constant 0 : index
    %52 = vector.load %arg12[%c0_56, %c0_57] : memref<256x128xf32, #tpu.memory_space<vmem>>, vector<256x128xf32>
    tpu.vector_store %arg12[%c0_56, %c0_57], %51 {strides = array<i32>} : memref<256x128xf32, #tpu.memory_space<vmem>>, vector<256x128xf32>,
    %c1_58 = arith.constant 1 : index
    %c1_59 = arith.constant 1 : index
    %c0_60 = arith.constant 0 : index
    %53 = vector.load %arg11[%c1_58, %c1_59, %c0_60] : memref<18x18x128xf32, #tpu.memory_space<vmem>>, vector<16x16x128xf32>
    %54 = vector.shape_cast %53 : vector<16x16x128xf32> to vector<256x128xf32>
    %55 = arith.truncf %54 : vector<256x128xf32> to vector<256x128xbf16>
    %c0_61 = arith.constant 0 : index
    %c0_62 = arith.constant 0 : index
    %56 = vector.load %arg12[%c0_61, %c0_62] : memref<256x128xf32, #tpu.memory_space<vmem>>, vector<256x128xf32>
    %c4 = arith.constant 4 : index
    %c0_63 = arith.constant 0 : index
    %c0_64 = arith.constant 0 : index
    %57 = vector.load %arg4[%c4, %c0_63, %c0_64] : memref<9x128x128xbf16, #tpu.memory_space<vmem>>, vector<1x128x128xbf16>
    %58 = vector.shape_cast %57 : vector<1x128x128xbf16> to vector<128x128xbf16>
    %cst_65 = arith.constant dense<0.000000e+00> : vector<256x128xf32>
    %59 = tpu.matmul %55, %58, %cst_65 {dimension_numbers = #tpu.dot_dimension_numbers<[1], [0], [0], [1], [0, 0, 1, 1], [], []>} : vector<256x128xbf16>, vector<128x128xbf16>, vector<256x128xf32> -> vector<256x128xf32>
    %60 = arith.addf %56, %59 : vector<256x128xf32>
    %c0_66 = arith.constant 0 : index
    %c0_67 = arith.constant 0 : index
    %61 = vector.load %arg12[%c0_66, %c0_67] : memref<256x128xf32, #tpu.memory_space<vmem>>, vector<256x128xf32>
    tpu.vector_store %arg12[%c0_66, %c0_67], %60 {strides = array<i32>} : memref<256x128xf32, #tpu.memory_space<vmem>>, vector<256x128xf32>,
    %c1_68 = arith.constant 1 : index
    %c2_69 = arith.constant 2 : index
    %c0_70 = arith.constant 0 : index
    %62 = vector.load %arg11[%c1_68, %c2_69, %c0_70] : memref<18x18x128xf32, #tpu.memory_space<vmem>>, vector<16x16x128xf32>
    %63 = vector.shape_cast %62 : vector<16x16x128xf32> to vector<256x128xf32>
    %64 = arith.truncf %63 : vector<256x128xf32> to vector<256x128xbf16>
    %c0_71 = arith.constant 0 : index
    %c0_72 = arith.constant 0 : index
    %65 = vector.load %arg12[%c0_71, %c0_72] : memref<256x128xf32, #tpu.memory_space<vmem>>, vector<256x128xf32>
    %c5 = arith.constant 5 : index
    %c0_73 = arith.constant 0 : index
    %c0_74 = arith.constant 0 : index
    %66 = vector.load %arg4[%c5, %c0_73, %c0_74] : memref<9x128x128xbf16, #tpu.memory_space<vmem>>, vector<1x128x128xbf16>
    %67 = vector.shape_cast %66 : vector<1x128x128xbf16> to vector<128x128xbf16>
    %cst_75 = arith.constant dense<0.000000e+00> : vector<256x128xf32>
    %68 = tpu.matmul %64, %67, %cst_75 {dimension_numbers = #tpu.dot_dimension_numbers<[1], [0], [0], [1], [0, 0, 1, 1], [], []>} : vector<256x128xbf16>, vector<128x128xbf16>, vector<256x128xf32> -> vector<256x128xf32>
    %69 = arith.addf %65, %68 : vector<256x128xf32>
    %c0_76 = arith.constant 0 : index
    %c0_77 = arith.constant 0 : index
    %70 = vector.load %arg12[%c0_76, %c0_77] : memref<256x128xf32, #tpu.memory_space<vmem>>, vector<256x128xf32>
    tpu.vector_store %arg12[%c0_76, %c0_77], %69 {strides = array<i32>} : memref<256x128xf32, #tpu.memory_space<vmem>>, vector<256x128xf32>,
    %c2_78 = arith.constant 2 : index
    %c0_79 = arith.constant 0 : index
    %c0_80 = arith.constant 0 : index
    %71 = vector.load %arg11[%c2_78, %c0_79, %c0_80] : memref<18x18x128xf32, #tpu.memory_space<vmem>>, vector<16x16x128xf32>
    %72 = vector.shape_cast %71 : vector<16x16x128xf32> to vector<256x128xf32>
    %73 = arith.truncf %72 : vector<256x128xf32> to vector<256x128xbf16>
    %c0_81 = arith.constant 0 : index
    %c0_82 = arith.constant 0 : index
    %74 = vector.load %arg12[%c0_81, %c0_82] : memref<256x128xf32, #tpu.memory_space<vmem>>, vector<256x128xf32>
    %c6 = arith.constant 6 : index
    %c0_83 = arith.constant 0 : index
    %c0_84 = arith.constant 0 : index
    %75 = vector.load %arg4[%c6, %c0_83, %c0_84] : memref<9x128x128xbf16, #tpu.memory_space<vmem>>, vector<1x128x128xbf16>
    %76 = vector.shape_cast %75 : vector<1x128x128xbf16> to vector<128x128xbf16>
    %cst_85 = arith.constant dense<0.000000e+00> : vector<256x128xf32>
    %77 = tpu.matmul %73, %76, %cst_85 {dimension_numbers = #tpu.dot_dimension_numbers<[1], [0], [0], [1], [0, 0, 1, 1], [], []>} : vector<256x128xbf16>, vector<128x128xbf16>, vector<256x128xf32> -> vector<256x128xf32>
    %78 = arith.addf %74, %77 : vector<256x128xf32>
    %c0_86 = arith.constant 0 : index
    %c0_87 = arith.constant 0 : index
    %79 = vector.load %arg12[%c0_86, %c0_87] : memref<256x128xf32, #tpu.memory_space<vmem>>, vector<256x128xf32>
    tpu.vector_store %arg12[%c0_86, %c0_87], %78 {strides = array<i32>} : memref<256x128xf32, #tpu.memory_space<vmem>>, vector<256x128xf32>,
    %c2_88 = arith.constant 2 : index
    %c1_89 = arith.constant 1 : index
    %c0_90 = arith.constant 0 : index
    %80 = vector.load %arg11[%c2_88, %c1_89, %c0_90] : memref<18x18x128xf32, #tpu.memory_space<vmem>>, vector<16x16x128xf32>
    %81 = vector.shape_cast %80 : vector<16x16x128xf32> to vector<256x128xf32>
    %82 = arith.truncf %81 : vector<256x128xf32> to vector<256x128xbf16>
    %c0_91 = arith.constant 0 : index
    %c0_92 = arith.constant 0 : index
    %83 = vector.load %arg12[%c0_91, %c0_92] : memref<256x128xf32, #tpu.memory_space<vmem>>, vector<256x128xf32>
    %c7 = arith.constant 7 : index
    %c0_93 = arith.constant 0 : index
    %c0_94 = arith.constant 0 : index
    %84 = vector.load %arg4[%c7, %c0_93, %c0_94] : memref<9x128x128xbf16, #tpu.memory_space<vmem>>, vector<1x128x128xbf16>
    %85 = vector.shape_cast %84 : vector<1x128x128xbf16> to vector<128x128xbf16>
    %cst_95 = arith.constant dense<0.000000e+00> : vector<256x128xf32>
    %86 = tpu.matmul %82, %85, %cst_95 {dimension_numbers = #tpu.dot_dimension_numbers<[1], [0], [0], [1], [0, 0, 1, 1], [], []>} : vector<256x128xbf16>, vector<128x128xbf16>, vector<256x128xf32> -> vector<256x128xf32>
    %87 = arith.addf %83, %86 : vector<256x128xf32>
    %c0_96 = arith.constant 0 : index
    %c0_97 = arith.constant 0 : index
    %88 = vector.load %arg12[%c0_96, %c0_97] : memref<256x128xf32, #tpu.memory_space<vmem>>, vector<256x128xf32>
    tpu.vector_store %arg12[%c0_96, %c0_97], %87 {strides = array<i32>} : memref<256x128xf32, #tpu.memory_space<vmem>>, vector<256x128xf32>,
    %c2_98 = arith.constant 2 : index
    %c2_99 = arith.constant 2 : index
    %c0_100 = arith.constant 0 : index
    %89 = vector.load %arg11[%c2_98, %c2_99, %c0_100] : memref<18x18x128xf32, #tpu.memory_space<vmem>>, vector<16x16x128xf32>
    %90 = vector.shape_cast %89 : vector<16x16x128xf32> to vector<256x128xf32>
    %91 = arith.truncf %90 : vector<256x128xf32> to vector<256x128xbf16>
    %c0_101 = arith.constant 0 : index
    %c0_102 = arith.constant 0 : index
    %92 = vector.load %arg12[%c0_101, %c0_102] : memref<256x128xf32, #tpu.memory_space<vmem>>, vector<256x128xf32>
    %c8 = arith.constant 8 : index
    %c0_103 = arith.constant 0 : index
    %c0_104 = arith.constant 0 : index
    %93 = vector.load %arg4[%c8, %c0_103, %c0_104] : memref<9x128x128xbf16, #tpu.memory_space<vmem>>, vector<1x128x128xbf16>
    %94 = vector.shape_cast %93 : vector<1x128x128xbf16> to vector<128x128xbf16>
    %cst_105 = arith.constant dense<0.000000e+00> : vector<256x128xf32>
    %95 = tpu.matmul %91, %94, %cst_105 {dimension_numbers = #tpu.dot_dimension_numbers<[1], [0], [0], [1], [0, 0, 1, 1], [], []>} : vector<256x128xbf16>, vector<128x128xbf16>, vector<256x128xf32> -> vector<256x128xf32>
    %96 = arith.addf %92, %95 : vector<256x128xf32>
    %c0_106 = arith.constant 0 : index
    %c0_107 = arith.constant 0 : index
    %97 = vector.load %arg12[%c0_106, %c0_107] : memref<256x128xf32, #tpu.memory_space<vmem>>, vector<256x128xf32>
    tpu.vector_store %arg12[%c0_106, %c0_107], %96 {strides = array<i32>} : memref<256x128xf32, #tpu.memory_space<vmem>>, vector<256x128xf32>,
    %c0_108 = arith.constant 0 : index
    %c0_109 = arith.constant 0 : index
    %98 = vector.load %arg12[%c0_108, %c0_109] : memref<256x128xf32, #tpu.memory_space<vmem>>, vector<256x128xf32>
    %c0_110 = arith.constant 0 : index
    %c0_111 = arith.constant 0 : index
    %99 = vector.load %arg5[%c0_110, %c0_111] : memref<1x128xf32, #tpu.memory_space<vmem>>, vector<1x128xf32>
    %100 = vector.broadcast %99 : vector<1x128xf32> to vector<256x128xf32>
    %101 = arith.addf %98, %100 : vector<256x128xf32>
    %c0_112 = arith.constant 0 : index
    %c0_113 = arith.constant 0 : index
    %102 = vector.load %arg6[%c0_112, %c0_113] : memref<1x128xf32, #tpu.memory_space<vmem>>, vector<1x128xf32>
    %103 = vector.broadcast %102 : vector<1x128xf32> to vector<256x128xf32>
    %104 = arith.mulf %101, %103 : vector<256x128xf32>
    %c0_114 = arith.constant 0 : index
    %c0_115 = arith.constant 0 : index
    %105 = vector.load %arg7[%c0_114, %c0_115] : memref<1x128xf32, #tpu.memory_space<vmem>>, vector<1x128xf32>
    %106 = vector.broadcast %105 : vector<1x128xf32> to vector<256x128xf32>
    %107 = arith.addf %104, %106 : vector<256x128xf32>
    %cst_116 = arith.constant 0.000000e+00 : f32
    %108 = vector.broadcast %cst_116 : f32 to vector<256x128xf32>
    %109 = arith.maximumf %107, %108 : vector<256x128xf32>
    %110 = arith.truncf %109 : vector<256x128xf32> to vector<256x128xbf16>
    %c0_117 = arith.constant 0 : index
    %c0_118 = arith.constant 0 : index
    %111 = vector.load %arg8[%c0_117, %c0_118] : memref<128x128xbf16, #tpu.memory_space<vmem>>, vector<128x128xbf16>
    %cst_119 = arith.constant dense<0.000000e+00> : vector<256x128xf32>
    %112 = tpu.matmul %110, %111, %cst_119 {dimension_numbers = #tpu.dot_dimension_numbers<[1], [0], [0], [1], [0, 0, 1, 1], [], []>} : vector<256x128xbf16>, vector<128x128xbf16>, vector<256x128xf32> -> vector<256x128xf32>
    %c0_120 = arith.constant 0 : index
    %c0_121 = arith.constant 0 : index
    %113 = vector.load %arg9[%c0_120, %c0_121] : memref<1x128xf32, #tpu.memory_space<vmem>>, vector<1x128xf32>
    %114 = vector.broadcast %113 : vector<1x128xf32> to vector<256x128xf32>
    %115 = arith.addf %112, %114 : vector<256x128xf32>
    %116 = vector.shape_cast %1 : vector<16x16x128xf32> to vector<256x128xf32>
    %117 = arith.addf %115, %116 : vector<256x128xf32>
    %118 = vector.shape_cast %117 : vector<256x128xf32> to vector<1x16x16x128xf32>
    %c0_122 = arith.constant 0 : index
    %c0_123 = arith.constant 0 : index
    %c0_124 = arith.constant 0 : index
    %c0_125 = arith.constant 0 : index
    %119 = vector.load %arg10[%c0_122, %c0_123, %c0_124, %c0_125] : memref<1x16x16x128xf32, #tpu.memory_space<vmem>>, vector<1x16x16x128xf32>
    tpu.vector_store %arg10[%c0_122, %c0_123, %c0_124, %c0_125], %118 {strides = array<i32>} : memref<1x16x16x128xf32, #tpu.memory_space<vmem>>, vector<1x16x16x128xf32>,
    return
  }
  func.func @transform_0(%arg0: i32) -> (i32, i32, i32, i32) {
    %c0_i32 = arith.constant 0 : i32
    %c0_i32_0 = arith.constant 0 : i32
    %c0_i32_1 = arith.constant 0 : i32
    %c0_i32_2 = arith.constant 0 : i32
    return %arg0, %c0_i32, %c0_i32_0, %c0_i32_1 : i32, i32, i32, i32
  }
  func.func @transform_1(%arg0: i32) -> (i32, i32) {
    %c0_i32 = arith.constant 0 : i32
    %c0_i32_0 = arith.constant 0 : i32
    %c0_i32_1 = arith.constant 0 : i32
    return %c0_i32, %c0_i32_0 : i32, i32
  }
  func.func @transform_2(%arg0: i32) -> (i32, i32) {
    %c0_i32 = arith.constant 0 : i32
    %c0_i32_0 = arith.constant 0 : i32
    %c0_i32_1 = arith.constant 0 : i32
    return %c0_i32, %c0_i32_0 : i32, i32
  }
  func.func @transform_3(%arg0: i32) -> (i32, i32, i32) {
    %c0_i32 = arith.constant 0 : i32
    %c0_i32_0 = arith.constant 0 : i32
    %c0_i32_1 = arith.constant 0 : i32
    %c0_i32_2 = arith.constant 0 : i32
    return %c0_i32, %c0_i32_0, %c0_i32_1 : i32, i32, i32
  }
  func.func @transform_4(%arg0: i32) -> (i32, i32) {
    %c0_i32 = arith.constant 0 : i32
    %c0_i32_0 = arith.constant 0 : i32
    %c0_i32_1 = arith.constant 0 : i32
    return %c0_i32, %c0_i32_0 : i32, i32
  }
  func.func @transform_5(%arg0: i32) -> (i32, i32) {
    %c0_i32 = arith.constant 0 : i32
    %c0_i32_0 = arith.constant 0 : i32
    %c0_i32_1 = arith.constant 0 : i32
    return %c0_i32, %c0_i32_0 : i32, i32
  }
  func.func @transform_6(%arg0: i32) -> (i32, i32) {
    %c0_i32 = arith.constant 0 : i32
    %c0_i32_0 = arith.constant 0 : i32
    %c0_i32_1 = arith.constant 0 : i32
    return %c0_i32, %c0_i32_0 : i32, i32
  }
  func.func @transform_7(%arg0: i32) -> (i32, i32) {
    %c0_i32 = arith.constant 0 : i32
    %c0_i32_0 = arith.constant 0 : i32
    %c0_i32_1 = arith.constant 0 : i32
    return %c0_i32, %c0_i32_0 : i32, i32
  }
  func.func @transform_8(%arg0: i32) -> (i32, i32) {
    %c0_i32 = arith.constant 0 : i32
    %c0_i32_0 = arith.constant 0 : i32
    %c0_i32_1 = arith.constant 0 : i32
    return %c0_i32, %c0_i32_0 : i32, i32
  }
  func.func @transform_9(%arg0: i32) -> (i32, i32, i32, i32) {
    %c0_i32 = arith.constant 0 : i32
    %c0_i32_0 = arith.constant 0 : i32
    %c0_i32_1 = arith.constant 0 : i32
    %c0_i32_2 = arith.constant 0 : i32
    return %arg0, %c0_i32, %c0_i32_0, %c0_i32_1 : i32, i32, i32, i32
  }
}

</mosaic_0001>

<bundles_post_ra>
// kernel: _lambda_.1
= control target key start
LH: loop header
LB: loop body
LE: loop exit
PB: predicated region body
PF: predicated region fallthrough
CT: control target
= control target key end

     0   :  { %14 = vsyncpa [#allocation5], 0  ;;  %s7098_s0 = inlined_call_operand.hbm [shape: f32[2,16,16,128], index: 0, kind: input, shape index: {}]   ;;  %s7099_s1 = inlined_call_operand.vmem [shape: f32[1,128], index: 1, kind: input, shape index: {}]   ;;  %s7100_s2 = inlined_call_operand.vmem [shape: f32[1,128], index: 2, kind: input, shape index: {}]   ;;  %s7101_s3 = inlined_call_operand.hbm [shape: bf16[9,128,128], index: 3, kind: input, shape index: {}]   ;;  %s7102_s4 = inlined_call_operand.vmem [shape: f32[1,128], index: 4, kind: input, shape index: {}]   ;;  %s7103_s5 = inlined_call_operand.vmem [shape: f32[1,128], index: 5, kind: input, shape index: {}]   ;;  %s7104_s6 = inlined_call_operand.vmem [shape: f32[1,128], index: 6, kind: input, shape index: {}]   ;;  %s7105_s7 = inlined_call_operand.hbm [shape: bf16[128,128], index: 7, kind: input, shape index: {}]   ;;  %s7106_s8 = inlined_call_operand.vmem [shape: f32[1,128], index: 8, kind: input, shape index: {}]   ;;  %s7107_s9 = inlined_call_operand.hbm [shape: f32[2,16,16,128], index: 9, kind: output, shape index: {}]  }
   0x1   :  { %16 = vsyncpa [#allocation5 + $0x1], 0 }
   0x2   :  { %17 = vsyncpa [#allocation8], 0 }
   0x3   :  { %18 = vsyncpa [#allocation6], 0 }
   0x4   :  { %20 = vsyncpa [#allocation6 + $0x1], 0  ;;  %s6060_s30 = smov 0   ;;  %s6062_s10 = smov 0  }
   0x5   :  { %s6064_s11 = smov 0   ;;  %s6066_s12 = smov 0  }
   0x6 LB: > { %s6081_s13 = sadd.s32 4294967295, %s5996_s12   ;;  %s4571_s14 = sadd.s32 4294967294, %s5996_s12   ;;  %s5996_s12 = sphi %s6066_s12, %s7130_s12   ;;  %s5992_s11 = sphi %s6064_s11, %s7129_s11   ;;  %s5988_s10 = sphi %s6062_s10, %s7128_s10   ;;  %s5984_s30 = sphi %s6060_s30, %s7127_s30  }
   0x7   : > { %p46_p0 = scmp.ne.s32.totalorder %s5988_s10, %s5984_s30  ;;  %p7108_p1 = scmp.eq.s32.totalorder %s6081_s13, 0 }
   0x8   : > { %p244_p3 = scmp.eq.s32.totalorder %s4571_s14, 1  ;;  %p4572_p5 = scmp.ge.s32.totalorder %s5996_s12, 1 }
   0x9   : > { %p6090_p4 = por %p7108_p1, %p46_p0  ;;  %p251_p7 = scmp.lt.s32.totalorder %s5996_s12, 3 }
   0xa   : > { %p6095_p6 = por %p244_p3, %p46_p0  ;;  %s5998_s18 = smov [#allocation7]  }
   0xb   : > { %s7112_s15 = scalar_select %p6090_p4, 1, 0 }
   0xc   : > { %s7113_s16 = scalar_select %p6095_p6, 1, 0 }
   0xd   : > { %p6100_p8 = pnand %p4572_p5, %p251_p7  ;;  %s269_s19 = sshll.u32 %s5998_s18, 4  ;;  %s6104_s19 = int_to_ptr.vmem [resolvable:$true] %s269_s19 }
   0xe   : > { %7114 = sst [smem:[#allocation14_spill]] %s7113_s16  ;;  %s5999_s21 = smov [#allocation9]  }
   0xf   : > { %p5665_p9 = pneg %p6100_p8  ;;  %s291_s22 = sshll.u32 %s5999_s21, 4  ;;  %s6115_s22 = int_to_ptr.vmem [resolvable:$true] %s291_s22 }
  0x10   : > { %s5840_s25 = scalar_lea.hbm %s7101_s3, 9216 }
  0x11   : > { %p6111_p11 = pnand %p5665_p9, %p7108_p1  ;;  %p5841_p12 = scmp.ne.s32.totalorder %s7101_s3, %s5840_s25 }
  0x12   : > { %p5847_p5 = scmp.lt.u32.totalorder %s5840_s25, %s7101_s3 }
  0x13   : > { %p5842_p13 = pneg %p6111_p11 }
  0x15   : > { %p5843_p0 = pnand %p5842_p13, %p5841_p12 }
  0x17   : > { %p5844_p3 = pneg %p5843_p0 }
  0x19   : > { %p5849_p7 = pnand %p5847_p5, %p5844_p3 }
  0x1b   : > { %5852 = shalt.err (!%p5849_p7)
}
  0x1c   : > { %s5853_s14 = scalar_lea.vmem %s6104_s19, 9216  ;;  %p5861_p2 = scmp.lt.s32.totalorder %s6104_s19, %s6104_s19 }
  0x1d   : > { %p5854_p9 = scmp.ne.s32.totalorder %s6104_s19, %s5853_s14  ;;  %p5862_p12 = scmp.lt.s32.totalorder %s5853_s14, %s5853_s14 }
  0x1f   : > { %p5856_p10 = pnand %p5854_p9, %p5842_p13  ;;  %p5863_p0 = por %p5862_p12, %p5861_p2 }
  0x21   : > { %p5857_p1 = pneg %p5856_p10 }
  0x23   : > { %p5864_p6 = pnand %p5863_p0, %p5857_p1 }
  0x25   : > { %5867 = shalt.err (!%p5864_p6)
}
  0x26   : > { %s6000_s18 = smov 64   ;;  %s6001_s21 = smov 4  }
  0x27   : > { %5668 = dma.hbm_to_vmem [thread:$0]  (!%p6111_p11), %s7101_s3, 9216, %s6104_s19, [#allocation8], %s6000_s18, %s6000_s18, %s6001_s21  }
  0x28   : > { %s5868_s27 = scalar_lea.hbm %s7105_s7, 1024 }
  0x29   : > { %p5869_p2 = scmp.ne.s32.totalorder %s7105_s7, %s5868_s27  ;;  %p5875_p10 = scmp.lt.u32.totalorder %s5868_s27, %s7105_s7 }
  0x2b   : > { %p5871_p1 = pnand %p5869_p2, %p5842_p13 }
  0x2d   : > { %p5872_p6 = pneg %p5871_p1 }
  0x2f   : > { %p5877_p3 = pnand %p5875_p10, %p5872_p6 }
  0x31   : > { %5880 = shalt.err (!%p5877_p3)
}
  0x32   : > { %s5881_s19 = scalar_lea.vmem %s6115_s22, 1024  ;;  %p5889_p12 = scmp.lt.s32.totalorder %s6115_s22, %s6115_s22 }
  0x33   : > { %p5882_p5 = scmp.ne.s32.totalorder %s6115_s22, %s5881_s19  ;;  %p5890_p0 = scmp.lt.s32.totalorder %s5881_s19, %s5881_s19 }
  0x35   : > { %p5884_p7 = pnand %p5882_p5, %p5842_p13  ;;  %p5891_p2 = por %p5890_p0, %p5889_p12 }
  0x37   : > { %p5885_p9 = pneg %p5884_p7 }
  0x39   : > { %p5892_p1 = pnand %p5891_p2, %p5885_p9 }
  0x3b   : > { %5895 = shalt.err (!%p5892_p1)
}
  0x3c   : > { %5671 = dma.hbm_to_vmem [thread:$0]  (!%p6111_p11), %s7105_s7, 1024, %s6115_s22, [#allocation8], %s6000_s18, %s6000_s18, %s6001_s21  }
  0x3d   : > { %s6170_s24 = sadd.s32 1, %s5996_s12   ;;  %s33_s20 = sadd.s32 1, %s5992_s11 }
  0x3e   : > { %s30_s25 = ssub.s32 %s5996_s12, %s6170_s24  ;;  %p40_p13 = scmp.ne.s32.totalorder %s5992_s11, %s5988_s10 }
  0x3f   : > { %p31_p6 = scmp.eq.s32.totalorder %s30_s25, 0  ;;  %p41_p10 = scmp.eq.s32.totalorder %s5996_s12, 0 }
  0x40   : > { %p7117_p3 = scmp.eq.s32.totalorder %s6081_s13, 1  ;;  %p5682_p7 = scmp.lt.s32.totalorder %s5996_s12, 2 }
  0x41   : > { %s6186_s27 = scalar_select %p31_p6, %s5992_s11, %s33_s20  }
  0x42   : > { %p6180_p5 = por %p7117_p3, %p40_p13  ;;  %p42_p9 = por %p41_p10, %p40_p13 }
  0x43   : > { %s308_s28 = sand.u32 1, %s5992_s11   ;;  %s4675_s22 = sshll.u32 %s5996_s12, 12 }
  0x44   : > { %s7118_s26 = scalar_select %p6180_p5, 1, 0 }
  0x45   : > { %s4576_s29 = sshll.u32 %s308_s28, 8  ;;  %s6193_s14 = scalar_lea.hbm %s7098_s0, %s4675_s22 }
  0x46   : > { %s312_s19 = scalar_lea.vmem [#allocation4], %s4576_s29  ;;  %p6197_p11 = pnand %p5682_p7, %p42_p9 }
  0x47   : > { %s319_s16 = sshll.u32 %s312_s19, 4  ;;  %s6201_s20 = scalar_lea.sflag [#allocation5], %s308_s28  ;;  %s6195_s16 = int_to_ptr.vmem [resolvable:$true] %s319_s16 }
  0x48   : > { %s5896_s25 = scalar_lea.hbm %s6193_s14, 4096  ;;  %p5898_p0 = pneg %p6197_p11 }
  0x49   : > { %p5897_p12 = scmp.ne.s32.totalorder %s6193_s14, %s5896_s25  ;;  %s5901_s18 = scalar_lea.hbm %s7098_s0, 8192 }
  0x4a   : > { %p5902_p13 = scmp.lt.u32.totalorder %s6193_s14, %s7098_s0  ;;  %p5903_p6 = scmp.lt.u32.totalorder %s5901_s18, %s5896_s25 }
  0x4b   : > { %p5899_p2 = pnand %p5898_p0, %p5897_p12  ;;  %p5905_p3 = scmp.lt.u32.totalorder %s5896_s25, %s6193_s14 }
  0x4c   : > { %p5904_p10 = por %p5903_p6, %p5902_p13 }
  0x4d   : > { %p5900_p1 = pneg %p5899_p2 }
  0x4e   : > { %p5906_p7 = por %p5905_p3, %p5904_p10 }
  0x50   : > { %p5907_p9 = pnand %p5906_p7, %p5900_p1 }
  0x52   : > { %5910 = shalt.err (!%p5907_p9)
}
  0x53   : > { %s5911_s28 = scalar_lea.vmem %s6195_s16, 4096  ;;  %s6002_s29 = smov [#allocation4]  }
  0x54   : > { %p5912_p12 = scmp.ne.s32.totalorder %s6195_s16, %s5911_s28  ;;  %s5916_s22 = sshll.u32 %s6002_s29, 4  ;;  %s5917_s22 = int_to_ptr.vmem [resolvable:$false] %s5916_s22 }
  0x55   : > { %s5918_s21 = scalar_lea.vmem %s5917_s22, 8192  ;;  %p5919_p4 = scmp.lt.s32.totalorder %s6195_s16, %s5917_s22 }
  0x56   : > { %p5914_p2 = pnand %p5912_p12, %p5898_p0  ;;  %p5920_p13 = scmp.lt.s32.totalorder %s5918_s21, %s5911_s28 }
  0x58   : > { %p5915_p5 = pneg %p5914_p2  ;;  %p5921_p6 = por %p5920_p13, %p5919_p4 }
  0x5a   : > { %p5922_p10 = pnand %p5921_p6, %p5915_p5 }
  0x5c   : > { %5925 = shalt.err (!%p5922_p10)
}
  0x5d   : > { %s6003_s25 = smov 128   ;;  %s6004_s18 = smov 8  }
  0x5e   : > { %5675 = dma.hbm_to_vmem [thread:$0]  (!%p6197_p11), %s6193_s14, 4096, %s6195_s16, %s6201_s20, %s6003_s25, %s6003_s25, %s6004_s18  }
  0x5f   : > { %331 = sbr.rel (%p6100_p8) target bundleno = 914 (0x392), region = 56  ;;  %s6232_s19 = sand.u32 (!%p6100_p8), 1, %s5988_s10  }
  0x60   : > { %s4580_s28 = sshll.u32 (!%p6100_p8), %s6232_s19, 8  ;;  %s334_s29 = scalar_lea.sflag (!%p6100_p8), [#allocation5], %s6232_s19 }
  0x61   : > { %s6238_s22 = scalar_lea.vmem (!%p6100_p8), [#allocation4], %s4580_s28  ;;  %p7120_p4 = scmp.ne.s32.totalorder (!%p6100_p8), %s7112_s15, 0 }
  0x66   : > { %5971 = dma.done.wait (%p7120_p4), %s334_s29, 4096  }
  0x67   : > { %5973 = vsyncadd (%p7120_p4), %s334_s29, 4294963200  ;;  %p7121_p5 = scmp.eq.s32.totalorder %s6081_s13, 0 }
  0x69   : > { %5975 = dma.done.wait (%p7121_p5), [#allocation8], 10240   ;;  %p7122_p8 = pmov %p7121_p5 }
  0x6a   : > { %v6005_v0 = vmov 0.0   ;;  %v6006_v1 = vmov 0.0|0.0   ;;  %v5727_v2 = vld [vmem:[#allocation7] sm:$0xff]   ;;  %v5729_v4 = vld [vmem:[#allocation7 + $0x8] sm:$0xff]   ;;  %v5731_v6 = vld [vmem:[#allocation7 + $0x10] sm:$0xff]   ;;  %s6955_s14 = scalar_lea.vmem [#allocation10], %s4580_s28 }
  0x6b   : > { %5977 = vsyncadd (%p7122_p8), [#allocation8], 4294957056  ;;  %413 = vst [vmem:[#allocation2] sm:$0xff] %v6005_v0  ;;  %4933 = vmatprep.mubr.bf16.mxu1 %v6006_v1  ;;  %v5728_v3 = vld [vmem:[#allocation7 + $0x100] sm:$0xff]   ;;  %4917 = vmatprep.subr.bf16.mxu1 %v5727_v2  ;;  %v5730_v5 = vld [vmem:[#allocation7 + $0x108] sm:$0xff]   ;;  %s4676_s28 = sshll.u32 %s6081_s13, 12 }
  0x6c   : > { %414 = vst [vmem:[#allocation2 + $0x8] sm:$0xff] %v6005_v0  ;;  %415 = vst [vmem:[#allocation2 + $0x10] sm:$0x3] %v6005_v0  ;;  %5109 = vmatprep.subr.bf16.mxu0 %v5728_v3  ;;  %4918 = vmatpush3.bf16.msra.mxu1 %v5727_v2  ;;  %v5732_v7 = vld [vmem:[#allocation7 + $0x110] sm:$0xff]   ;;  %v5733_v8 = vld [vmem:[#allocation7 + $0x18] sm:$0xff]   ;;  %s4479_s16 = sshll.u32 %s6955_s14, 4  ;;  %s7048_s13 = scalar_lea.hbm %s7107_s9, %s4676_s28  ;;  %s7050_s16 = int_to_ptr.vmem [resolvable:$true] %s4479_s16 }
  0x6d   : > { %416 = vst [vmem:[#allocation2 + $0x18] sm:$0xff] %v6005_v0  ;;  %417 = vst [vmem:[#allocation2 + $0x20] sm:$0xff] %v6005_v0  ;;  %5110 = vmatpush3.bf16.msra.mxu0 %v5728_v3  ;;  %4919 = vmatprep.subr.bf16.mxu1 %v5729_v4  ;;  %v5734_v9 = vld [vmem:[#allocation7 + $0x118] sm:$0xff]   ;;  %v5735_v10 = vld [vmem:[#allocation7 + $0x20] sm:$0xff]   ;;  %s4466_s21 = scalar_lea.sflag [#allocation6], %s6232_s19  ;;  %s5926_s25 = scalar_lea.vmem %s7050_s16, 4096 }
  0x6e   : > { %418 = vst [vmem:[#allocation2 + $0x28] sm:$0x3] %v6005_v0  ;;  %419 = vst [vmem:[#allocation2 + $0x30] sm:$0xff] %v6005_v0  ;;  %5111 = vmatprep.subr.bf16.mxu0 %v5730_v5  ;;  %v5736_v11 = vld [vmem:[#allocation7 + $0x120] sm:$0xff]   ;;  %v5737_v12 = vld [vmem:[#allocation7 + $0x28] sm:$0xff]   ;;  %p5927_p11 = scmp.ne.s32.totalorder %s7050_s16, %s5926_s25  ;;  %p7123_p0 = scmp.ne.s32.totalorder %s7118_s26, 0 }
  0x6f   : > { %420 = vst [vmem:[#allocation2 + $0x38] sm:$0xff] %v6005_v0  ;;  %421 = vst [vmem:[#allocation2 + $0x40] sm:$0x3] %v6005_v0  ;;  %v5738_v13 = vld [vmem:[#allocation7 + $0x128] sm:$0xff]   ;;  %v381_v14 = vld [vmem:[%s6238_s22] sm:$0xff]  ;;  %s6007_s18 = smov [#allocation10]  }
  0x70   : > { %422 = vst [vmem:[#allocation2 + $0x48] sm:$0xff] %v6005_v0  ;;  %423 = vst [vmem:[#allocation2 + $0x50] sm:$0xff] %v6005_v0  ;;  %4920 = vmatpush3.bf16.msra.mxu1 %v5729_v4  ;;  %v382_v15 = vld [vmem:[%s6238_s22 + $0x8] sm:$0xff]  ;;  %v6253_v16 = vld [vmem:[%s7099_s1] ss:$0 sm:$0xff]  ;;  %p5928_p1 = pnand %p5927_p11, %p7123_p0  ;;  %s5930_s29 = sshll.u32 %s6007_s18, 4  ;;  %s5931_s29 = int_to_ptr.vmem [resolvable:$false] %s5930_s29 }
  0x71   : > { %424 = vst [vmem:[#allocation2 + $0x58] sm:$0x3] %v6005_v0  ;;  %425 = vst [vmem:[#allocation2 + $0x60] sm:$0xff] %v6005_v0  ;;  %5112 = vmatpush3.bf16.msra.mxu0 %v5730_v5  ;;  %4921 = vmatprep.subr.bf16.mxu1 %v5731_v6  ;;  %v474_v17 = vmul.f32 %v6253_v16, %v381_v14  ;;  %v475_v18 = vmul.f32 %v6253_v16, %v382_v15  ;;  %v6260_v19 = vld [vmem:[%s7100_s2] ss:$0 sm:$0xff]  ;;  %v384_v21 = vld [vmem:[%s6238_s22 + $0x18] sm:$0xff]  ;;  %p5933_p7 = scmp.lt.s32.totalorder %s7050_s16, %s5931_s29 }
  0x72   : > { %426 = vst [vmem:[#allocation2 + $0x68] sm:$0xff] %v6005_v0  ;;  %427 = vst [vmem:[#allocation2 + $0x70] sm:$0x3] %v6005_v0  ;;  %5113 = vmatprep.subr.bf16.mxu0 %v5732_v7  ;;  %v383_v20 = vld [vmem:[%s6238_s22 + $0x10] sm:$0xff]  ;;  %v477_v24 = vmul.f32 %v6253_v16, %v384_v21  ;;  %v385_v27 = vld [vmem:[%s6238_s22 + $0x20] sm:$0xff]  ;;  %p5929_p3 = pneg %p5928_p1  ;;  %s5932_s15 = scalar_lea.vmem %s5931_s29, 8192 }
  0x73   : > { %428 = vst [vmem:[#allocation2 + $0x78] sm:$0xff] %v6005_v0  ;;  %429 = vst [vmem:[#allocation2 + $0x80] sm:$0xff] %v6005_v0  ;;  %v5739_v22 = vld [vmem:[#allocation7 + $0x30] sm:$0xff]   ;;  %v476_v23 = vmul.f32 %v6253_v16, %v383_v20  ;;  %v513_v25 = vadd.f32 %v6260_v19, %v474_v17  ;;  %v514_v26 = vadd.f32 %v6260_v19, %v475_v18  ;;  %v386_v28 = vld [vmem:[%s6238_s22 + $0x28] sm:$0xff]  ;;  %p5934_p9 = scmp.lt.s32.totalorder %s5932_s15, %s5926_s25 }
  0x74   : > { %430 = vst [vmem:[#allocation2 + $0x88] sm:$0x3] %v6005_v0  ;;  %431 = vst [vmem:[#allocation2 + $0x90] sm:$0xff] %v6005_v0  ;;  %4922 = vmatpush3.bf16.msra.mxu1 %v5731_v6  ;;  %v387_v29 = vld [vmem:[%s6238_s22 + $0x30] sm:$0xff]  ;;  %v6275_v31 = vadd.f32 %v6260_v19, %v477_v24  ;;  %v478_v32 = vmul.f32 %v6253_v16, %v385_v27  ;;  %v388_v33 = vld [vmem:[%s6238_s22 + $0x38] sm:$0xff]  ;;  %v479_v37 = vmul.f32 %v6253_v16, %v386_v28 }
  0x75   : > { %432 = vst [vmem:[#allocation2 + $0x98] sm:$0xff] %v6005_v0  ;;  %433 = vst [vmem:[#allocation2 + $0xa0] sm:$0x3] %v6005_v0  ;;  %5114 = vmatpush3.bf16.msra.mxu0 %v5732_v7  ;;  %4923 = vmatprep.subr.bf16.mxu1 %v5733_v8  ;;  %v6272_v30 = vadd.f32 %v6260_v19, %v476_v23  ;;  %v5740_v34 = vld [vmem:[#allocation7 + $0x130] sm:$0xff]   ;;  %v545_v35 = vmax.f32 %v513_v25, 0.0  ;;  %v546_v36 = vmax.f32 %v514_v26, 0.0  ;;  %p5935_p12 = por %p5934_p9, %p5933_p7 }
  0x76   : > { %434 = vst [vmem:[#allocation2 + $0xa8] sm:$0xff] %v6005_v0  ;;  %435 = vst [vmem:[#allocation2 + $0xb0] sm:$0xff] %v6005_v0  ;;  %5115 = vmatprep.subr.bf16.mxu0 %v5734_v9  ;;  %v480_v38 = vmul.f32 %v6253_v16, %v387_v29  ;;  %v389_v39 = vld [vmem:[%s6238_s22 + $0x40] sm:$0xff]  ;;  %v390_v40 = vld [vmem:[%s6238_s22 + $0x48] sm:$0xff]  ;;  %v548_v42 = vmax.f32 %v6275_v31, 0.0  ;;  %v6286_v43 = vadd.f32 %v6260_v19, %v478_v32 }
  0x77   : > { %436 = vst [vmem:[#allocation2 + $0xb8] sm:$0x3] %v6005_v0  ;;  %437 = vst [vmem:[#allocation2 + $0xc0] sm:$0xff] %v6005_v0  ;;  %v547_v41 = vmax.f32 %v6272_v30, 0.0  ;;  %v481_v44 = vmul.f32 %v6253_v16, %v388_v33  ;;  %v391_v45 = vld [vmem:[%s6238_s22 + $0x50] sm:$0xff]  ;;  %v6290_v46 = vpack.c.bf16 %v546_v36, %v545_v35  ;;  %v6293_v47 = vadd.f32 %v6260_v19, %v479_v37  ;;  %v392_v50 = vld [vmem:[%s6238_s22 + $0x58] sm:$0xff]  ;;  %p5936_p2 = pnand %p5935_p12, %p5929_p3 }
  0x78   : > { %438 = vst [vmem:[#allocation2 + $0xc8] sm:$0xff] %v6005_v0  ;;  %439 = vst [vmem:[#allocation2 + $0xd0] sm:$0x3] %v6005_v0  ;;  %4924 = vmatpush3.bf16.msra.mxu1 %v5733_v8  ;;  %v6296_v48 = vadd.f32 %v6260_v19, %v480_v38  ;;  %v482_v49 = vmul.f32 %v6253_v16, %v389_v39  ;;  %v393_v51 = vld [vmem:[%s6238_s22 + $0x60] sm:$0xff]  ;;  %v5741_v52 = vld [vmem:[#allocation7 + $0x38] sm:$0xff]   ;;  %v549_v54 = vmax.f32 %v6286_v43, 0.0 }
  0x79   : > { %440 = vst [vmem:[#allocation2 + $0xd8] sm:$0xff] %v6005_v0  ;;  %441 = vst [vmem:[#allocation2 + $0xe0] sm:$0xff] %v6005_v0  ;;  %5116 = vmatpush3.bf16.msra.mxu0 %v5734_v9  ;;  %4925 = vmatprep.subr.bf16.mxu1 %v5735_v10  ;;  %v5742_v53 = vld [vmem:[#allocation7 + $0x138] sm:$0xff]   ;;  %v6303_v55 = vadd.f32 %v6260_v19, %v481_v44  ;;  %v483_v56 = vmul.f32 %v6253_v16, %v390_v40  ;;  %v394_v57 = vld [vmem:[%s6238_s22 + $0x68] sm:$0xff]  ;;  %v550_v58 = vmax.f32 %v6293_v47, 0.0 }
  0x7a   : > { %442 = vst [vmem:[#allocation2 + $0xe8] sm:$0x3] %v6005_v0  ;;  %443 = vst [vmem:[#allocation2 + $0xf0] sm:$0xff] %v6005_v0  ;;  %5117 = vmatprep.subr.bf16.mxu0 %v5736_v11  ;;  %5125 = vmatprep.mubr.bf16.mxu0 %v6290_v46  ;;  %v551_v59 = vmax.f32 %v6296_v48, 0.0  ;;  %v6311_v60 = vadd.f32 %v6260_v19, %v482_v49  ;;  %v484_v61 = vmul.f32 %v6253_v16, %v391_v45  ;;  %v395_v2 = vld [vmem:[%s6238_s22 + $0x70] sm:$0xff]  ;;  %v396_v3 = vld [vmem:[%s6238_s22 + $0x78] sm:$0xff] }
  0x7b   : > { %444 = vst [vmem:[#allocation2 + $0xf8] sm:$0xff] %v6005_v0  ;;  %445 = vst [vmem:[#allocation2 + $0x100] sm:$0x3] %v6005_v0  ;;  %v552_v62 = vmax.f32 %v6303_v55, 0.0  ;;  %v6316_v63 = vadd.f32 %v6260_v19, %v483_v56  ;;  %v486_v1 = vmul.f32 %v6253_v16, %v393_v51  ;;  %v6322_v4 = vld [vmem:[#allocation7 + $0x140] sm:$0xff]   ;;  %v487_v7 = vmul.f32 %v6253_v16, %v394_v57  ;;  %v399_v20 = vld [vmem:[%s6238_s22 + $0x90] sm:$0xff] }
  0x7c   : > { %446 = vst [vmem:[#allocation2 + $0x108] sm:$0xff] %v6005_v0  ;;  %447 = vst [vmem:[#allocation2 + $0x110] sm:$0xff] %v6005_v0  ;;  %4926 = vmatpush3.bf16.msra.mxu1 %v5735_v10  ;;  %v553_v5 = vmax.f32 %v6311_v60, 0.0  ;;  %v6328_v6 = vadd.f32 %v6260_v19, %v484_v61  ;;  %v397_v8 = vld [vmem:[%s6238_s22 + $0x80] sm:$0xff]  ;;  %v488_v17 = vmul.f32 %v6253_v16, %v395_v2  ;;  %v6360_v30 = vld [vmem:[#allocation7 + $0x148] sm:$0xff]  }
  0x7d   : > { %448 = vst [vmem:[#allocation2 + $0x118] sm:$0x3] %v6005_v0  ;;  %449 = vst [vmem:[#allocation2 + $0x120] sm:$0xff] %v6005_v0  ;;  %5118 = vmatpush3.bf16.msra.mxu0 %v5736_v11  ;;  %4927 = vmatprep.subr.bf16.mxu1 %v5737_v12  ;;  %v554_v9 = vmax.f32 %v6316_v63, 0.0  ;;  %v6339_v11 = vadd.f32 %v6260_v19, %v486_v1  ;;  %v6348_v15 = vadd.f32 %v6260_v19, %v487_v7  ;;  %v5749_v39 = vld [vmem:[#allocation7 + $0x48] sm:$0xff]   ;;  %v401_v40 = vld [vmem:[%s6238_s22 + $0xa0] sm:$0xff] }
  0x7e   : > { %450 = vst [vmem:[#allocation2 + $0x128] sm:$0xff] %v6005_v0  ;;  %451 = vst [vmem:[#allocation2 + $0x130] sm:$0x3] %v6005_v0  ;;  %5119 = vmatprep.subr.bf16.mxu0 %v5738_v13  ;;  %v555_v14 = vmax.f32 %v6328_v6, 0.0  ;;  %v489_v18 = vmul.f32 %v6253_v16, %v396_v3  ;;  %v6353_v23 = vpack.c.bf16 %v548_v42, %v547_v41  ;;  %v402_v45 = vld [vmem:[%s6238_s22 + $0xa8] sm:$0xff]  ;;  %v5745_v3 = vld [vmem:[#allocation7 + $0x150] sm:$0xff]  }
  0x7f   : > { %452 = vst [vmem:[#allocation2 + $0x138] sm:$0xff] %v6005_v0  ;;  %453 = vst [vmem:[#allocation2 + $0x140] sm:$0xff] %v6005_v0  ;;  %v557_v25 = vmax.f32 %v6339_v11, 0.0  ;;  %v490_v26 = vmul.f32 %v6253_v16, %v397_v8  ;;  %v558_v31 = vmax.f32 %v6348_v15, 0.0  ;;  %v6366_v32 = vadd.f32 %v6260_v19, %v488_v17  ;;  %v405_v17 = vld [vmem:[%s6238_s22 + $0xc0] sm:$0xff] }
  0x80   : > { %454 = vst [vmem:[#allocation2 + $0x148] sm:$0x3] %v6005_v0  ;;  %455 = vst [vmem:[#allocation2 + $0x150] sm:$0xff] %v6005_v0  ;;  %4928 = vmatpush3.bf16.msra.mxu1 %v5737_v12  ;;  %v398_v12 = vld [vmem:[%s6238_s22 + $0x88] sm:$0xff]  ;;  %v6369_v33 = vadd.f32 %v6260_v19, %v489_v18  ;;  %v492_v44 = vmul.f32 %v6253_v16, %v399_v20  ;;  %v6417_v61 = vpack.c.bf16 %v552_v62, %v551_v59 }
  0x81   : > { %456 = vst [vmem:[#allocation2 + $0x158] sm:$0xff] %v6005_v0  ;;  %457 = vst [vmem:[#allocation2 + $0x160] sm:$0x3] %v6005_v0  ;;  %5120 = vmatpush3.bf16.msra.mxu0 %v5738_v13  ;;  %4929 = vmatprep.subr.bf16.mxu1 %v5739_v22  ;;  %v6342_v13 = vld [vmem:[#allocation7 + $0x40] sm:$0xff]   ;;  %v491_v37 = vmul.f32 %v6253_v16, %v398_v12  ;;  %v6380_v38 = vadd.f32 %v6260_v19, %v490_v26 }
  0x82   : > { %458 = vst [vmem:[#allocation2 + $0x168] sm:$0xff] %v6005_v0  ;;  %459 = vst [vmem:[#allocation2 + $0x170] sm:$0xff] %v6005_v0  ;;  %5121 = vmatprep.subr.bf16.mxu0 %v5740_v34  ;;  %v560_v43 = vmax.f32 %v6369_v33, 0.0  ;;  %v6408_v57 = vadd.f32 %v6260_v19, %v492_v44  ;;  %v495_v2 = vmul.f32 %v6253_v16, %v402_v45 }
  0x83   : > { %460 = vst [vmem:[#allocation2 + $0x178] sm:$0x3] %v6005_v0  ;;  %461 = vst [vmem:[#allocation2 + $0x180] sm:$0xff] %v6005_v0  ;;  %v561_v51 = vmax.f32 %v6380_v38, 0.0  ;;  %v498_v26 = vmul.f32 %v6253_v16, %v405_v17 }
  0x84   : > { %462 = vst [vmem:[#allocation2 + $0x188] sm:$0xff] %v6005_v0  ;;  %463 = vst [vmem:[#allocation2 + $0x190] sm:$0x3] %v6005_v0  ;;  %4930 = vmatpush3.bf16.msra.mxu1 %v5739_v22  ;;  %v563_v48 = vmax.f32 %v6408_v57, 0.0  ;;  %v6440_v12 = vadd.f32 %v6260_v19, %v495_v2  ;;  %v410_v2 = vld [vmem:[%s6238_s22 + $0xe8] sm:$0xff] }
  0x85   : > { %464 = vst [vmem:[#allocation2 + $0x198] sm:$0xff] %v6005_v0  ;;  %465 = vst [vmem:[#allocation2 + $0x1a0] sm:$0xff] %v6005_v0  ;;  %5122 = vmatpush3.bf16.msra.mxu0 %v5740_v34  ;;  %4931 = vmatprep.subr.bf16.mxu1 %v5741_v52  ;;  %v400_v34 = vld [vmem:[%s6238_s22 + $0x98] sm:$0xff]  ;;  %v6470_v63 = vadd.f32 %v6260_v19, %v498_v26  ;;  %v411_v26 = vld [vmem:[%s6238_s22 + $0xf0] sm:$0xff] }
  0x86   : > { %466 = vst [vmem:[#allocation2 + $0x1a8] sm:$0x3] %v6005_v0  ;;  %578 = vst [vmem:[#allocation2 + $0x19] sm:$0xff] %v545_v35  ;;  %v485_v0 = vmul.f32 %v6253_v16, %v392_v50  ;;  %5123 = vmatprep.subr.bf16.mxu0 %v5742_v53  ;;  %v6396_v50 = vadd.f32 %v6260_v19, %v491_v37  ;;  %v5752_v37 = vld [vmem:[#allocation7 + $0x58] sm:$0xff]  }
  0x87   : > { %579 = vst [vmem:[#allocation2 + $0x21] sm:$0xff] %v546_v36  ;;  %580 = vst [vmem:[#allocation2 + $0x31] sm:$0xff] %v547_v41  ;;  %v6372_v36 = vpack.c.bf16 %v550_v58, %v549_v54  ;;  %v569_v45 = vmax.f32 %v6470_v63, 0.0 }
  0x88   : > { %581 = vst [vmem:[#allocation2 + $0x39] sm:$0xff] %v548_v42  ;;  %582 = vst [vmem:[#allocation2 + $0x49] sm:$0xff] %v549_v54  ;;  %v6336_v10 = vadd.f32 %v6260_v19, %v485_v0  ;;  %4932 = vmatpush3.bf16.msra.mxu1 %v5741_v52  ;;  %v559_v42 = vmax.f32 %v6366_v32, 0.0  ;;  %v493_v52 = vmul.f32 %v6253_v16, %v400_v34  ;;  %v403_v54 = vld [vmem:[%s6238_s22 + $0xb0] sm:$0xff]  ;;  %v562_v0 = vmax.f32 %v6396_v50, 0.0  ;;  %v5746_v34 = vld [vmem:[#allocation7 + $0x158] sm:$0xff]  }
  0x89   : > { %583 = vst [vmem:[#allocation2 + $0x51] sm:$0xff] %v550_v58  ;;  %584 = vst [vmem:[#allocation2 + $0x61] sm:$0xff] %v551_v59  ;;  %5124 = vmatpush3.bf16.msra.mxu0 %v5742_v53  ;;  %4965 = vmatprep.subr.bf16.mxu1 %v6342_v13  ;;  %v494_v53 = vmul.f32 %v6253_v16, %v401_v40  ;;  %v404_v58 = vld [vmem:[%s6238_s22 + $0xb8] sm:$0xff]  ;;  %v496_v59 = vmul.f32 %v6253_v16, %v403_v54  ;;  %v5748_v54 = vld [vmem:[#allocation7 + $0x160] sm:$0xff]  }
  0x8a   : > { %585 = vst [vmem:[#allocation2 + $0x69] sm:$0xff] %v552_v62  ;;  %586 = vst [vmem:[#allocation2 + $0x79] sm:$0xff] %v553_v5  ;;  %v556_v24 = vmax.f32 %v6336_v10, 0.0  ;;  %5157 = vmatprep.subr.bf16.mxu0 %v6322_v4  ;;  %v6423_v1 = vadd.f32 %v6260_v19, %v493_v52  ;;  %v497_v62 = vmul.f32 %v6253_v16, %v404_v58  ;;  %v409_v58 = vld [vmem:[%s6238_s22 + $0xe0] sm:$0xff]  ;;  %v412_v10 = vld [vmem:[%s6238_s22 + $0xf8] sm:$0xff] }
  0x8b   : > { %587 = vst [vmem:[#allocation2 + $0x81] sm:$0xff] %v554_v9  ;;  %588 = vst [vmem:[#allocation2 + $0x91] sm:$0xff] %v555_v14  ;;  %v6430_v55 = vadd.f32 %v6260_v19, %v494_v53  ;;  %v6447_v20 = vadd.f32 %v6260_v19, %v496_v59  ;;  %v5753_v59 = vld [vmem:[#allocation7 + $0x60] sm:$0xff]   ;;  %v505_v15 = vmul.f32 %v6253_v16, %v412_v10  ;;  %v5758_v32 = vld [vmem:[#allocation7 + $0x78] sm:$0xff]  }
  0x8c   : > { %589 = vst [vmem:[#allocation2 + $0x99] sm:$0xff] %v556_v24  ;;  %590 = vst [vmem:[#allocation2 + $0xa9] sm:$0xff] %v557_v25  ;;  %5126 = vmatmul.mubr.bf16.vlgmr.msra.gmra.mrb[0].mxu0 %v6353_v23  ;;  %v564_v8 = vmax.f32 %v6423_v1, 0.0  ;;  %v6577_v50 = vld [vmem:[#allocation7 + $0x180] sm:$0xff]  }
  0x8d   : > { %v644_v21 = vld [vmem:[#allocation2 + $0x18] sm:$0xff]  ;;  %591 = vst [vmem:[#allocation2 + $0xb1] sm:$0xff] %v558_v31  ;;  %592 = vst [vmem:[#allocation2 + $0xc1] sm:$0xff] %v559_v42  ;;  %5158 = vmatpush3.bf16.msra.mxu0 %v6322_v4  ;;  %5129 = vmatprep.mubr.bf16.mxu0 %v6372_v36  ;;  %v565_v18 = vmax.f32 %v6430_v55, 0.0 }
  0x8e   : > { %v645_v22 = vld [vmem:[#allocation2 + $0x20] sm:$0xff]  ;;  %v646_v28 = vld [vmem:[#allocation2 + $0x30] sm:$0xff]  ;;  %593 = vst [vmem:[#allocation2 + $0xc9] sm:$0xff] %v560_v43  ;;  %594 = vst [vmem:[#allocation2 + $0xd9] sm:$0xff] %v561_v51  ;;  %5159 = vmatprep.subr.bf16.mxu0 %v6360_v30 }
  0x8f   : > { %v675_v27 = vpack.c.bf16 %v645_v22, %v644_v21  ;;  %v647_v29 = vld [vmem:[#allocation2 + $0x38] sm:$0xff]  ;;  %v6384_v41 = vld [vmem:[#allocation2 + $0x48] sm:$0xff]  ;;  %595 = vst [vmem:[#allocation2 + $0xe1] sm:$0xff] %v562_v0  ;;  %596 = vst [vmem:[#allocation2 + $0xf1] sm:$0xff] %v563_v48  ;;  %v6450_v21 = vadd.f32 %v6260_v19, %v497_v62 }
  0x90   : > { %v676_v35 = vpack.c.bf16 %v647_v29, %v646_v28  ;;  %v649_v47 = vld [vmem:[#allocation2 + $0x50] sm:$0xff]  ;;  %v6393_v49 = vld [vmem:[#allocation2 + $0x60] sm:$0xff]  ;;  %v406_v22 = vld [vmem:[%s6238_s22 + $0xc8] sm:$0xff]  ;;  %597 = vst [vmem:[#allocation2 + $0xf9] sm:$0xff] %v564_v8  ;;  %v566_v28 = vmax.f32 %v6440_v12, 0.0 }
  0x91   : > { %4934 = vmatmul.mubr.bf16.vlgmr.msra.gmra.mrb[0].mxu1 %v675_v27  ;;  %v651_v56 = vld [vmem:[#allocation2 + $0x68] sm:$0xff]  ;;  %v677_v4 = vpack.c.bf16 %v649_v47, %v6384_v41  ;;  %5160 = vmatpush3.bf16.msra.mxu0 %v6360_v30  ;;  %v6459_v27 = vpack.c.bf16 %v554_v9, %v553_v5  ;;  %v499_v29 = vmul.f32 %v6253_v16, %v406_v22  ;;  %v567_v30 = vmax.f32 %v6447_v20, 0.0  ;;  %v407_v5 = vld [vmem:[%s6238_s22 + $0xd0] sm:$0xff] }
  0x92   : > { %4937 = vmatprep.mubr.bf16.mxu1 %v676_v35  ;;  %4966 = vmatpush3.bf16.msra.mxu1 %v6342_v13  ;;  %v678_v7 = vpack.c.bf16 %v651_v56, %v6393_v49  ;;  %v5750_v13 = vld [vmem:[#allocation7 + $0x50] sm:$0xff]   ;;  %598 = vst [vmem:[#allocation2 + $0x109] sm:$0xff] %v565_v18  ;;  %v568_v60 = vmax.f32 %v6450_v21, 0.0  ;;  %v408_v9 = vld [vmem:[%s6238_s22 + $0xd8] sm:$0xff]  ;;  %v652_v35 = vld [vmem:[#allocation2 + $0x78] sm:$0xff]  ;;  %v500_v40 = vmul.f32 %v6253_v16, %v407_v5 }
  0x93   : > { %4967 = vmatprep.subr.bf16.mxu1 %v5749_v39  ;;  %5161 = vmatprep.subr.bf16.mxu0 %v5745_v3  ;;  %599 = vst [vmem:[#allocation2 + $0x111] sm:$0xff] %v566_v28  ;;  %v653_v41 = vld [vmem:[#allocation2 + $0x80] sm:$0xff]  ;;  %v654_v44 = vld [vmem:[#allocation2 + $0x90] sm:$0xff]  ;;  %600 = vst [vmem:[#allocation2 + $0x121] sm:$0xff] %v567_v30  ;;  %v501_v47 = vmul.f32 %v6253_v16, %v408_v9  ;;  %v503_v22 = vmul.f32 %v6253_v16, %v410_v2 }
  0x94   : > { %5130 = vmatmul.mubr.bf16.gmra.mrb[4].mxu0 %v6417_v61  ;;  %601 = vst [vmem:[#allocation2 + $0x129] sm:$0xff] %v568_v60  ;;  %v655_v49 = vld [vmem:[#allocation2 + $0x98] sm:$0xff]  ;;  %v6490_v53 = vadd.f32 %v6260_v19, %v500_v40  ;;  %602 = vst [vmem:[#allocation2 + $0x139] sm:$0xff] %v569_v45  ;;  %v656_v5 = vld [vmem:[#allocation2 + $0xa8] sm:$0xff]  ;;  %v6571_v2 = vpack.c.bf16 %v562_v0, %v561_v51  ;;  %v6585_v0 = vpack.c.bf16 %v564_v8, %v563_v48 }
  0x95   : > { %5133 = vmatprep.mubr.bf16.mxu0 %v6459_v27  ;;  %5162 = vmatpush3.bf16.msra.mxu0 %v5745_v3  ;;  %v6495_v56 = vadd.f32 %v6260_v19, %v501_v47  ;;  %v6499_v3 = vpack.c.bf16 %v653_v41, %v652_v35  ;;  %v6532_v11 = vadd.f32 %v6260_v19, %v503_v22  ;;  %v657_v9 = vld [vmem:[#allocation2 + $0xb0] sm:$0xff]  ;;  %v659_v40 = vld [vmem:[#allocation2 + $0xc8] sm:$0xff]  ;;  %v660_v33 = vld [vmem:[#allocation2 + $0xd8] sm:$0xff] }
  0x96   : > { %4968 = vmatpush3.bf16.msra.mxu1 %v5749_v39  ;;  %v6477_v39 = vadd.f32 %v6260_v19, %v499_v29  ;;  %5163 = vmatprep.subr.bf16.mxu0 %v5746_v34  ;;  %v571_v62 = vmax.f32 %v6490_v53, 0.0  ;;  %v6520_v29 = vpack.c.bf16 %v558_v31, %v557_v25  ;;  %v5755_v25 = vld [vmem:[#allocation7 + $0x68] sm:$0xff]   ;;  %v6593_v22 = vpack.c.bf16 %v566_v28, %v565_v18 }
  0x97   : > { %4969 = vmatprep.subr.bf16.mxu1 %v5750_v13  ;;  %v572_v17 = vmax.f32 %v6495_v56, 0.0  ;;  %v574_v35 = vmax.f32 %v6532_v11, 0.0  ;;  %v663_v38 = vld [vmem:[#allocation2 + $0xf8] sm:$0xff]  ;;  %v6606_v12 = vpack.c.bf16 %v568_v60, %v567_v30  ;;  %v1012_v56 = vld [vmem:[#allocation2 + $0x9] sm:$0xff] }
  0x98   : > { %v570_v52 = vmax.f32 %v6477_v39, 0.0  ;;  %604 = vst [vmem:[#allocation2 + $0x151] sm:$0xff] %v571_v62 }
  0x99   : > { %4938 = vmatmul.mubr.bf16.gmra.mrb[4].mxu1 %v677_v4  ;;  %v502_v4 = vmul.f32 %v6253_v16, %v409_v58  ;;  %5164 = vmatpush3.bf16.msra.mxu0 %v5746_v34  ;;  %605 = vst [vmem:[#allocation2 + $0x159] sm:$0xff] %v572_v17  ;;  %607 = vst [vmem:[#allocation2 + $0x171] sm:$0xff] %v574_v35  ;;  %v664_v57 = vld [vmem:[#allocation2 + $0x108] sm:$0xff]  ;;  %v6626_v63 = vpack.c.bf16 %v572_v17, %v571_v62  ;;  %v2491_v62 = vld [vmem:[#allocation2 + $0x1a] sm:$0xff] }
  0x9a   : > { %4941 = vmatprep.mubr.bf16.mxu1 %v678_v7  ;;  %4970 = vmatpush3.bf16.msra.mxu1 %v5750_v13  ;;  %603 = vst [vmem:[#allocation2 + $0x141] sm:$0xff] %v570_v52  ;;  %v6509_v7 = vpack.c.bf16 %v556_v24, %v555_v14  ;;  %v6511_v13 = vpack.c.bf16 %v655_v49, %v654_v44  ;;  %v5751_v24 = vld [vmem:[#allocation7 + $0x168] sm:$0xff]   ;;  %v5754_v44 = vld [vmem:[#allocation7 + $0x170] sm:$0xff]   ;;  %v665_v1 = vld [vmem:[#allocation2 + $0x110] sm:$0xff] }
  0x9b   : > { %4971 = vmatprep.subr.bf16.mxu1 %v5752_v37  ;;  %v6525_v6 = vadd.f32 %v6260_v19, %v502_v4  ;;  %v504_v14 = vmul.f32 %v6253_v16, %v411_v26  ;;  %5165 = vmatprep.subr.bf16.mxu0 %v5748_v54  ;;  %v658_v16 = vld [vmem:[#allocation2 + $0xc0] sm:$0xff]  ;;  %v5763_v26 = vld [vmem:[#allocation7 + $0x80] sm:$0xff]   ;;  %v667_v55 = vld [vmem:[#allocation2 + $0x128] sm:$0xff]  ;;  %v6600_v8 = vpack.c.bf16 %v665_v1, %v664_v57 }
  0x9c   : > { %5134 = vmatmul.mubr.bf16.gmra.mrb[8].mxu0 %v6509_v7  ;;  %v5756_v49 = vld [vmem:[#allocation7 + $0x70] sm:$0xff]   ;;  %v6563_v58 = vpack.c.bf16 %v659_v40, %v658_v16  ;;  %v6614_v28 = vpack.c.bf16 %v570_v52, %v569_v45  ;;  %v668_v10 = vld [vmem:[#allocation2 + $0x138] sm:$0xff]  ;;  %v5769_v57 = vld [vmem:[#allocation7 + $0xa0] sm:$0xff]  }
  0x9d   : > { %v573_v31 = vmax.f32 %v6525_v6, 0.0  ;;  %v6538_v34 = vadd.f32 %v6260_v19, %v504_v14  ;;  %5137 = vmatprep.mubr.bf16.mxu0 %v6520_v29  ;;  %5166 = vmatpush3.bf16.msra.mxu0 %v5748_v54  ;;  %v6561_v54 = vpack.c.bf16 %v560_v43, %v559_v42  ;;  %v661_v42 = vld [vmem:[#allocation2 + $0xe0] sm:$0xff]  ;;  %v662_v43 = vld [vmem:[#allocation2 + $0xf0] sm:$0xff] }
  0x9e   : > { %4972 = vmatpush3.bf16.msra.mxu1 %v5752_v37  ;;  %v6544_v37 = vadd.f32 %v6260_v19, %v505_v15  ;;  %5167 = vmatprep.subr.bf16.mxu0 %v5751_v24  ;;  %v6553_v19 = vpack.c.bf16 %v657_v9, %v656_v5  ;;  %v6579_v51 = vpack.c.bf16 %v661_v42, %v660_v33  ;;  %v666_v48 = vld [vmem:[#allocation2 + $0x120] sm:$0xff]  ;;  %v2495_v5 = vld [vmem:[#allocation2 + $0x4a] sm:$0xff]  ;;  %v2496_v9 = vld [vmem:[#allocation2 + $0x52] sm:$0xff] }
  0x9f   : > { %4973 = vmatprep.subr.bf16.mxu1 %v5753_v59  ;;  %606 = vst [vmem:[#allocation2 + $0x169] sm:$0xff] %v573_v31  ;;  %v575_v41 = vmax.f32 %v6538_v34, 0.0  ;;  %v6587_v4 = vpack.c.bf16 %v663_v38, %v662_v43  ;;  %v6608_v18 = vpack.c.bf16 %v667_v55, %v666_v48  ;;  %v670_v21 = vld [vmem:[#allocation2 + $0x150] sm:$0xff]  ;;  %v6634_v45 = vpack.c.bf16 %v574_v35, %v573_v31  ;;  %v1011_v14 = vld [vmem:[#allocation2 + $0x1] sm:$0xff]  ;;  %v5760_v34 = vld [vmem:[#allocation7 + $0x188] sm:$0xff]  }
  0xa0   : > { %v576_v47 = vmax.f32 %v6544_v37, 0.0  ;;  %v671_v30 = vld [vmem:[#allocation2 + $0x158] sm:$0xff]  ;;  %v2492_v17 = vld [vmem:[#allocation2 + $0x22] sm:$0xff]  ;;  %v1043_v11 = vpack.c.bf16 %v1012_v56, %v1011_v14  ;;  %v6652_v16 = vpack.c.bf16 %v2496_v9, %v2495_v5  ;;  %v2503_v38 = vld [vmem:[#allocation2 + $0xaa] sm:$0xff] }
  0xa1   : > { %4942 = vmatmul.mubr.bf16.gmra.mrb[8].mxu1 %v6499_v3  ;;  %608 = vst [vmem:[#allocation2 + $0x181] sm:$0xff] %v575_v41  ;;  %5168 = vmatpush3.bf16.msra.mxu0 %v5751_v24  ;;  %v669_v20 = vld [vmem:[#allocation2 + $0x140] sm:$0xff]  ;;  %v6628_v39 = vpack.c.bf16 %v671_v30, %v670_v21  ;;  %v6646_v15 = vpack.c.bf16 %v2492_v17, %v2491_v62  ;;  %v5765_v37 = vld [vmem:[#allocation7 + $0x88] sm:$0xff]   ;;  %v5762_v33 = vld [vmem:[#allocation7 + $0x198] sm:$0xff]  }
  0xa2   : > { %4945 = vmatprep.mubr.bf16.mxu1 %v6511_v13  ;;  %4974 = vmatpush3.bf16.msra.mxu1 %v5753_v59  ;;  %609 = vst [vmem:[#allocation2 + $0x189] sm:$0xff] %v576_v47  ;;  %v5757_v59 = vld [vmem:[#allocation7 + $0x178] sm:$0xff]   ;;  %v6620_v60 = vpack.c.bf16 %v669_v20, %v668_v10  ;;  %v2168_v6 = vpack.c.bf16 %v576_v47, %v575_v41  ;;  %v2494_v31 = vld [vmem:[#allocation2 + $0x3a] sm:$0xff]  ;;  %v2501_v42 = vld [vmem:[#allocation2 + $0x92] sm:$0xff] }
  0xa3   : > { %4975 = vmatprep.subr.bf16.mxu1 %v5755_v25  ;;  %5169 = vmatprep.subr.bf16.mxu0 %v5754_v44  ;;  %v2497_v40 = vld [vmem:[#allocation2 + $0x62] sm:$0xff]  ;;  %v2498_v41 = vld [vmem:[#allocation2 + $0x6a] sm:$0xff]  ;;  %v2502_v43 = vld [vmem:[#allocation2 + $0x9a] sm:$0xff] }
  0xa4   : > { %5138 = vmatmul.mubr.bf16.gmra.mrb[12].mxu0 %v6561_v54  ;;  %v2500_v47 = vld [vmem:[#allocation2 + $0x82] sm:$0xff]  ;;  %v6667_v1 = vpack.c.bf16 %v2502_v43, %v2501_v42  ;;  %v5767_v48 = vld [vmem:[#allocation7 + $0x1a8] sm:$0xff]   ;;  %v2506_v10 = vld [vmem:[#allocation2 + $0xca] sm:$0xff] }
  0xa5   : > { %5141 = vmatprep.mubr.bf16.mxu0 %v6571_v2  ;;  %5170 = vmatpush3.bf16.msra.mxu0 %v5754_v44  ;;  %v2499_v44 = vld [vmem:[#allocation2 + $0x7a] sm:$0xff]  ;;  %v2508_v21 = vld [vmem:[#allocation2 + $0xe2] sm:$0xff]  ;;  %v2509_v56 = vld [vmem:[#allocation2 + $0xf2] sm:$0xff] }
  0xa6   : > { %4976 = vmatpush3.bf16.msra.mxu1 %v5755_v25  ;;  %5171 = vmatprep.subr.bf16.mxu0 %v5757_v59  ;;  %v672_v52 = vld [vmem:[#allocation2 + $0x168] sm:$0xff]  ;;  %v673_v53 = vld [vmem:[#allocation2 + $0x170] sm:$0xff]  ;;  %v5771_v55 = vld [vmem:[#allocation7 + $0xa8] sm:$0xff]  }
  0xa7   : > { %4977 = vmatprep.subr.bf16.mxu1 %v5756_v49  ;;  %v6640_v24 = vpack.c.bf16 %v673_v53, %v672_v52  ;;  %v2493_v25 = vld [vmem:[#allocation2 + $0x32] sm:$0xff]  ;;  %v2507_v20 = vld [vmem:[#allocation2 + $0xda] sm:$0xff]  ;;  %v5774_v53 = vld [vmem:[#allocation7 + $0xb8] sm:$0xff]  }
  0xa8   : > { %v6650_v35 = vpack.c.bf16 %v2494_v31, %v2493_v25  ;;  %v5770_v30 = vld [vmem:[#allocation7 + $0x1b0] sm:$0xff]   ;;  %v2511_v17 = vld [vmem:[#allocation2 + $0x10a] sm:$0xff]  ;;  %v2863_v42 = vld [vmem:[#allocation2 + $0x38] sm:$0xff] }
  0xa9   : > { %4946 = vmatmul.mubr.bf16.gmra.mrb[12].mxu1 %v6553_v19  ;;  %5172 = vmatpush3.bf16.msra.mxu0 %v5757_v59  ;;  %v5766_v59 = vld [vmem:[#allocation7 + $0x90] sm:$0xff]   ;;  %v5779_v25 = vld [vmem:[#allocation7 + $0xc0] sm:$0xff]  }
  0xaa   : > { %4949 = vmatprep.mubr.bf16.mxu1 %v6563_v58  ;;  %4978 = vmatpush3.bf16.msra.mxu1 %v5756_v49  ;;  %v5761_v49 = vld [vmem:[#allocation7 + $0x190] sm:$0xff]   ;;  %v2514_v5 = vld [vmem:[#allocation2 + $0x12a] sm:$0xff] }
  0xab   : > { %4979 = vmatprep.subr.bf16.mxu1 %v5758_v32  ;;  %5205 = vmatprep.subr.bf16.mxu0 %v6577_v50  ;;  %v5772_v52 = vld [vmem:[#allocation7 + $0xb0] sm:$0xff]  }
  0xac   : > { %5142 = vmatmul.mubr.bf16.gmra.mrb[16].mxu0 %v6585_v0  ;;  %v2510_v62 = vld [vmem:[#allocation2 + $0xfa] sm:$0xff] }
  0xad   : > { %5145 = vmatprep.mubr.bf16.mxu0 %v6593_v22  ;;  %v6683_v31 = vpack.c.bf16 %v2510_v62, %v2509_v56  ;;  %v2515_v9 = vld [vmem:[#allocation2 + $0x13a] sm:$0xff]  ;;  %v3237_v56 = vld [vmem:[#allocation2 + $0x69] sm:$0xff] }
  0xae   : > { %4980 = vmatpush3.bf16.msra.mxu1 %v5758_v32  ;;  %v6659_v32 = vpack.c.bf16 %v2498_v41, %v2497_v40  ;;  %v2519_v41 = vld [vmem:[#allocation2 + $0x16a] sm:$0xff] }
  0xaf   : > { %5013 = vmatprep.subr.bf16.mxu1 %v5763_v26 }
  0xb1   : > { %4950 = vmatmul.mubr.bf16.gmra.mrb[16].mxu1 %v6579_v51 }
  0xb2   : > { %4953 = vmatprep.mubr.bf16.mxu1 %v6587_v4 }
  0xb4   : > { %5146 = vmatmul.mubr.bf16.gmra.mrb[20].mxu0 %v6606_v12 }
  0xb5   : > { %5149 = vmatprep.mubr.bf16.mxu0 %v6614_v28 }
  0xb9   : > { %4954 = vmatmul.mubr.bf16.gmra.mrb[20].mxu1 %v6600_v8 }
  0xba   : > { %4957 = vmatprep.mubr.bf16.mxu1 %v6608_v18 }
  0xbc   : > { %5150 = vmatmul.mubr.bf16.gmra.mrb[24].mxu0 %v6626_v63 }
  0xbd   : > { %5153 = vmatprep.mubr.bf16.mxu0 %v6634_v45 }
  0xc1   : > { %4958 = vmatmul.mubr.bf16.gmra.mrb[24].mxu1 %v6620_v60 }
  0xc2   : > { %4961 = vmatprep.mubr.bf16.mxu1 %v6628_v39 }
  0xc4   : > { %5154 = vmatmul.mubr.bf16.gmra.mrb[28].mxu0 %v2168_v6  ;;  %v2512_v6 = vld [vmem:[#allocation2 + $0x112] sm:$0xff] }
  0xc5   : > { %5173 = vmatprep.mubr.bf16.mxu0 %v6646_v15 }
  0xc9   : > { %4962 = vmatmul.mubr.bf16.gmra.mrb[28].mxu1 %v6640_v24 }
  0xca   : > { %4981 = vmatprep.mubr.bf16.mxu1 %v1043_v11  ;;  %v5775_v11 = vld [vmem:[#allocation7 + $0x1c0] sm:$0xff]  }
  0xcc   : > { %5174 = vmatmul.mubr.bf16.vlgmr.msra.gmra.mrb[0].mxu0 %v6650_v35 }
  0xcd   : > { %5206 = vmatpush3.bf16.msra.mxu0 %v6577_v50  ;;  %5177 = vmatprep.mubr.bf16.mxu0 %v6652_v16  ;;  %v2504_v50 = vld [vmem:[#allocation2 + $0xb2] sm:$0xff] }
  0xce   : > { %5207 = vmatprep.subr.bf16.mxu0 %v5760_v34 }
  0xd1   : > { %4982 = vmatmul.mubr.bf16.vlgmr.msra.gmra.mrb[0].mxu1 %v6290_v46  ;;  %5208 = vmatpush3.bf16.msra.mxu0 %v5760_v34  ;;  %v6661_v46 = vpack.c.bf16 %v2500_v47, %v2499_v44  ;;  %v2516_v34 = vld [vmem:[#allocation2 + $0x142] sm:$0xff]  ;;  %v2520_v44 = vld [vmem:[#allocation2 + $0x172] sm:$0xff] }
  0xd2   : > { %4985 = vmatprep.mubr.bf16.mxu1 %v6353_v23  ;;  %5014 = vmatpush3.bf16.msra.mxu1 %v5763_v26  ;;  %v5768_v23 = vld [vmem:[#allocation7 + $0x98] sm:$0xff]   ;;  %v5764_v26 = vld [vmem:[#allocation7 + $0x1a0] sm:$0xff]   ;;  %v6693_v40 = vpack.c.bf16 %v2516_v34, %v2515_v9  ;;  %v3241_v9 = vld [vmem:[#allocation2 + $0x99] sm:$0xff] }
  0xd3   : > { %5015 = vmatprep.subr.bf16.mxu1 %v5765_v37  ;;  %5209 = vmatprep.subr.bf16.mxu0 %v5761_v49  ;;  %v5793_v34 = vld [vmem:[#allocation7 + $0x210] sm:$0xff]  }
  0xd4   : > { %5178 = vmatmul.mubr.bf16.gmra.mrb[4].mxu0 %v6659_v32 }
  0xd5   : > { %5181 = vmatprep.mubr.bf16.mxu0 %v6661_v46  ;;  %5210 = vmatpush3.bf16.msra.mxu0 %v5761_v49  ;;  %v6701_v49 = vpack.c.bf16 %v2520_v44, %v2519_v41  ;;  %v5794_v44 = vld [vmem:[#allocation7 + $0x218] sm:$0xff]  }
  0xd6   : > { %5016 = vmatpush3.bf16.msra.mxu1 %v5765_v37  ;;  %5211 = vmatprep.subr.bf16.mxu0 %v5762_v33 }
  0xd7   : > { %5017 = vmatprep.subr.bf16.mxu1 %v5766_v59 }
  0xd9   : > { %4986 = vmatmul.mubr.bf16.gmra.mrb[4].mxu1 %v6372_v36  ;;  %v6669_v36 = vpack.c.bf16 %v2504_v50, %v2503_v38  ;;  %5212 = vmatpush3.bf16.msra.mxu0 %v5762_v33  ;;  %v1382_v33 = vld [vmem:[#allocation2 + $0xa] sm:$0xff] }
  0xda   : > { %4989 = vmatprep.mubr.bf16.mxu1 %v6417_v61  ;;  %5018 = vmatpush3.bf16.msra.mxu1 %v5766_v59  ;;  %v2505_v61 = vld [vmem:[#allocation2 + $0xc2] sm:$0xff] }
  0xdb   : > { %5019 = vmatprep.subr.bf16.mxu1 %v5768_v23  ;;  %5213 = vmatprep.subr.bf16.mxu0 %v5764_v26  ;;  %v6675_v14 = vpack.c.bf16 %v2506_v10, %v2505_v61  ;;  %v1381_v59 = vld [vmem:[#allocation2 + $0x2] sm:$0xff]  ;;  %v5776_v61 = vld [vmem:[#allocation7 + $0x1c8] sm:$0xff]  }
  0xdc   : > { %5182 = vmatmul.mubr.bf16.gmra.mrb[8].mxu0 %v6667_v1  ;;  %v1413_v38 = vpack.c.bf16 %v1382_v33, %v1381_v59  ;;  %v5781_v10 = vld [vmem:[#allocation7 + $0xc8] sm:$0xff]   ;;  %v3242_v59 = vld [vmem:[#allocation2 + $0xa9] sm:$0xff] }
  0xdd   : > { %5185 = vmatprep.mubr.bf16.mxu0 %v6669_v36  ;;  %5214 = vmatpush3.bf16.msra.mxu0 %v5764_v26  ;;  %v2866_v26 = vld [vmem:[#allocation2 + $0x60] sm:$0xff]  ;;  %v3243_v33 = vld [vmem:[#allocation2 + $0xb1] sm:$0xff] }
  0xde   : > { %5020 = vmatpush3.bf16.msra.mxu1 %v5768_v23  ;;  %5215 = vmatprep.subr.bf16.mxu0 %v5767_v48  ;;  %v2862_v23 = vld [vmem:[#allocation2 + $0x30] sm:$0xff] }
  0xdf   : > { %5021 = vmatprep.subr.bf16.mxu1 %v5769_v57  ;;  %v6709_v50 = vpack.c.bf16 %v2863_v42, %v2862_v23  ;;  %v1763_v23 = vld [vmem:[#allocation2 + $0xa8] sm:$0xff]  ;;  %v1764_v42 = vld [vmem:[#allocation2 + $0xb0] sm:$0xff] }
  0xe1   : > { %4990 = vmatmul.mubr.bf16.gmra.mrb[8].mxu1 %v6459_v27  ;;  %v6677_v27 = vpack.c.bf16 %v2508_v21, %v2507_v20  ;;  %5216 = vmatpush3.bf16.msra.mxu0 %v5767_v48  ;;  %v5782_v20 = vld [vmem:[#allocation7 + $0xd0] sm:$0xff]   ;;  %v5778_v21 = vld [vmem:[#allocation7 + $0x1d8] sm:$0xff]  }
  0xe2   : > { %4993 = vmatprep.mubr.bf16.mxu1 %v6509_v7  ;;  %5022 = vmatpush3.bf16.msra.mxu1 %v5769_v57  ;;  %v5773_v7 = vld [vmem:[#allocation7 + $0x1b8] sm:$0xff]  }
  0xe3   : > { %5023 = vmatprep.subr.bf16.mxu1 %v5771_v55  ;;  %5217 = vmatprep.subr.bf16.mxu0 %v5770_v30  ;;  %v2867_v57 = vld [vmem:[#allocation2 + $0x68] sm:$0xff] }
  0xe4   : > { %5186 = vmatmul.mubr.bf16.gmra.mrb[12].mxu0 %v6675_v14 }
  0xe5   : > { %5189 = vmatprep.mubr.bf16.mxu0 %v6677_v27  ;;  %5218 = vmatpush3.bf16.msra.mxu0 %v5770_v30  ;;  %v5785_v30 = vld [vmem:[#allocation7 + $0xe0] sm:$0xff]  }
  0xe6   : > { %5024 = vmatpush3.bf16.msra.mxu1 %v5771_v55  ;;  %5219 = vmatprep.subr.bf16.mxu0 %v5773_v7  ;;  %v6716_v55 = vpack.c.bf16 %v2867_v57, %v2866_v26  ;;  %v3269_v26 = vpack.c.bf16 %v3243_v33, %v3242_v59  ;;  %v1789_v57 = vpack.c.bf16 %v1764_v42, %v1763_v23  ;;  %v3261_v59 = vld [vmem:[#allocation2 + $0x189] sm:$0xff] }
  0xe7   : > { %5025 = vmatprep.subr.bf16.mxu1 %v5772_v52 }
  0xe9   : > { %4994 = vmatmul.mubr.bf16.gmra.mrb[12].mxu1 %v6520_v29  ;;  %v6685_v29 = vpack.c.bf16 %v2512_v6, %v2511_v17  ;;  %5220 = vmatpush3.bf16.msra.mxu0 %v5773_v7  ;;  %v3234_v7 = vld [vmem:[#allocation2 + $0x49] sm:$0xff]  ;;  %v5792_v6 = vld [vmem:[#allocation7 + $0x208] sm:$0xff]  }
  0xea   : > { %4997 = vmatprep.mubr.bf16.mxu1 %v6561_v54  ;;  %5026 = vmatpush3.bf16.msra.mxu1 %v5772_v52  ;;  %v2513_v54 = vld [vmem:[#allocation2 + $0x122] sm:$0xff]  ;;  %v5783_v52 = vld [vmem:[#allocation7 + $0x1e8] sm:$0xff]  }
  0xeb   : > { %5027 = vmatprep.subr.bf16.mxu1 %v5774_v53  ;;  %5253 = vmatprep.subr.bf16.mxu0 %v5775_v11  ;;  %v6691_v37 = vpack.c.bf16 %v2514_v5, %v2513_v54  ;;  %v1760_v54 = vld [vmem:[#allocation2 + $0x80] sm:$0xff]  ;;  %v3240_v5 = vld [vmem:[#allocation2 + $0x91] sm:$0xff] }
  0xec   : > { %5190 = vmatmul.mubr.bf16.gmra.mrb[16].mxu0 %v6683_v31  ;;  %v3268_v41 = vpack.c.bf16 %v3241_v9, %v3240_v5 }
  0xed   : > { %5193 = vmatprep.mubr.bf16.mxu0 %v6685_v29 }
  0xee   : > { %5028 = vmatpush3.bf16.msra.mxu1 %v5774_v53  ;;  %v3235_v53 = vld [vmem:[#allocation2 + $0x51] sm:$0xff] }
  0xef   : > { %5061 = vmatprep.subr.bf16.mxu1 %v5779_v25  ;;  %v3265_v62 = vpack.c.bf16 %v3235_v53, %v3234_v7  ;;  %v1773_v53 = vld [vmem:[#allocation2 + $0x120] sm:$0xff] }
  0xf1   : > { %4998 = vmatmul.mubr.bf16.gmra.mrb[16].mxu1 %v6571_v2  ;;  %v2517_v2 = vld [vmem:[#allocation2 + $0x152] sm:$0xff] }
  0xf2   : > { %5001 = vmatprep.mubr.bf16.mxu1 %v6585_v0  ;;  %v2518_v0 = vld [vmem:[#allocation2 + $0x15a] sm:$0xff] }
  0xf3   : > { %v6699_v47 = vpack.c.bf16 %v2518_v0, %v2517_v2 }
  0xf4   : > { %5194 = vmatmul.mubr.bf16.gmra.mrb[20].mxu0 %v6691_v37 }
  0xf5   : > { %5197 = vmatprep.mubr.bf16.mxu0 %v6693_v40 }
  0xf9   : > { %5002 = vmatmul.mubr.bf16.gmra.mrb[20].mxu1 %v6593_v22  ;;  %v2521_v22 = vld [vmem:[#allocation2 + $0x182] sm:$0xff] }
  0xfa   : > { %5005 = vmatprep.mubr.bf16.mxu1 %v6606_v12  ;;  %v2522_v12 = vld [vmem:[#allocation2 + $0x18a] sm:$0xff] }
  0xfb   : > { %v6707_v43 = vpack.c.bf16 %v2522_v12, %v2521_v22  ;;  %v1761_v22 = vld [vmem:[#allocation2 + $0x90] sm:$0xff]  ;;  %v1762_v12 = vld [vmem:[#allocation2 + $0x98] sm:$0xff] }
  0xfc   : > { %5198 = vmatmul.mubr.bf16.gmra.mrb[24].mxu0 %v6699_v47 }
  0xfd   : > { %5201 = vmatprep.mubr.bf16.mxu0 %v6701_v49 }
 0x101   : > { %5006 = vmatmul.mubr.bf16.gmra.mrb[24].mxu1 %v6614_v28  ;;  %v2864_v28 = vld [vmem:[#allocation2 + $0x48] sm:$0xff] }
 0x102   : > { %5009 = vmatprep.mubr.bf16.mxu1 %v6626_v63  ;;  %v2865_v63 = vld [vmem:[#allocation2 + $0x50] sm:$0xff] }
 0x103   : > { %v6714_v48 = vpack.c.bf16 %v2865_v63, %v2864_v28  ;;  %v5795_v28 = vld [vmem:[#allocation7 + $0x220] sm:$0xff]   ;;  %v1788_v63 = vpack.c.bf16 %v1762_v12, %v1761_v22  ;;  %v3260_v12 = vld [vmem:[#allocation2 + $0x181] sm:$0xff] }
 0x104   : > { %5202 = vmatmul.mubr.bf16.gmra.mrb[28].mxu0 %v6707_v43  ;;  %v1780_v22 = vld [vmem:[#allocation2 + $0x170] sm:$0xff] }
 0x105   : > { %5221 = vmatprep.mubr.bf16.mxu0 %v6709_v50 }
 0x109   : > { %5010 = vmatmul.mubr.bf16.gmra.mrb[28].mxu1 %v6634_v45  ;;  %v5777_v45 = vld [vmem:[#allocation7 + $0x1d0] sm:$0xff]  }
 0x10a   : > { %5029 = vmatprep.mubr.bf16.mxu1 %v1413_v38  ;;  %v3244_v38 = vld [vmem:[#allocation2 + $0xc1] sm:$0xff] }
 0x10c   : > { %5222 = vmatmul.mubr.bf16.vlgmr.msra.gmra.mrb[0].mxu0 %v6714_v48 }
 0x10d   : > { %5254 = vmatpush3.bf16.msra.mxu0 %v5775_v11  ;;  %5225 = vmatprep.mubr.bf16.mxu0 %v6716_v55  ;;  %v3238_v11 = vld [vmem:[#allocation2 + $0x79] sm:$0xff] }
 0x10e   : > { %5255 = vmatprep.subr.bf16.mxu0 %v5776_v61 }
 0x111   : > { %5030 = vmatmul.mubr.bf16.vlgmr.msra.gmra.mrb[0].mxu1 %v6646_v15  ;;  %5256 = vmatpush3.bf16.msra.mxu0 %v5776_v61  ;;  %v5784_v15 = vld [vmem:[#allocation7 + $0xd8] sm:$0xff]   ;;  %v1765_v61 = vld [vmem:[#allocation2 + $0xc0] sm:$0xff] }
 0x112   : > { %5033 = vmatprep.mubr.bf16.mxu1 %v6650_v35  ;;  %5062 = vmatpush3.bf16.msra.mxu1 %v5779_v25  ;;  %v5780_v35 = vld [vmem:[#allocation7 + $0x1e0] sm:$0xff]   ;;  %v3239_v25 = vld [vmem:[#allocation2 + $0x81] sm:$0xff] }
 0x113   : > { %5063 = vmatprep.subr.bf16.mxu1 %v5781_v10  ;;  %5257 = vmatprep.subr.bf16.mxu0 %v5777_v45  ;;  %v3267_v2 = vpack.c.bf16 %v3239_v25, %v3238_v11  ;;  %v3256_v11 = vld [vmem:[#allocation2 + $0x151] sm:$0xff]  ;;  %v3257_v25 = vld [vmem:[#allocation2 + $0x159] sm:$0xff] }
 0x114   : > { %5226 = vmatmul.mubr.bf16.gmra.mrb[4].mxu0 %v6499_v3  ;;  %v5786_v3 = vld [vmem:[#allocation7 + $0x1f0] sm:$0xff]   ;;  %v3276_v9 = vpack.c.bf16 %v3257_v25, %v3256_v11 }
 0x115   : > { %5229 = vmatprep.mubr.bf16.mxu0 %v6511_v13  ;;  %5258 = vmatpush3.bf16.msra.mxu0 %v5777_v45  ;;  %v5788_v13 = vld [vmem:[#allocation7 + $0xf0] sm:$0xff]  }
 0x116   : > { %5064 = vmatpush3.bf16.msra.mxu1 %v5781_v10  ;;  %5259 = vmatprep.subr.bf16.mxu0 %v5778_v21  ;;  %v1766_v10 = vld [vmem:[#allocation2 + $0xc8] sm:$0xff]  ;;  %v3246_v45 = vld [vmem:[#allocation2 + $0xd9] sm:$0xff] }
 0x117   : > { %5065 = vmatprep.subr.bf16.mxu1 %v5782_v20 }
 0x119   : > { %5034 = vmatmul.mubr.bf16.gmra.mrb[4].mxu1 %v6652_v16  ;;  %5260 = vmatpush3.bf16.msra.mxu0 %v5778_v21  ;;  %v5787_v16 = vld [vmem:[#allocation7 + $0xe8] sm:$0xff]  }
 0x11a   : > { %5037 = vmatprep.mubr.bf16.mxu1 %v6659_v32  ;;  %5066 = vmatpush3.bf16.msra.mxu1 %v5782_v20  ;;  %v5789_v32 = vld [vmem:[#allocation7 + $0x1f8] sm:$0xff]   ;;  %v1767_v21 = vld [vmem:[#allocation2 + $0xd8] sm:$0xff] }
 0x11b   : > { %5067 = vmatprep.subr.bf16.mxu1 %v5784_v15  ;;  %5261 = vmatprep.subr.bf16.mxu0 %v5780_v35  ;;  %v3247_v20 = vld [vmem:[#allocation2 + $0xe1] sm:$0xff] }
 0x11c   : > { %5230 = vmatmul.mubr.bf16.gmra.mrb[8].mxu0 %v6553_v19  ;;  %v5791_v19 = vld [vmem:[#allocation7 + $0x200] sm:$0xff]  }
 0x11d   : > { %5233 = vmatprep.mubr.bf16.mxu0 %v6563_v58  ;;  %5262 = vmatpush3.bf16.msra.mxu0 %v5780_v35  ;;  %v2890_v58 = vld [vmem:[#allocation2 + $0x180] sm:$0xff]  ;;  %v3248_v35 = vld [vmem:[#allocation2 + $0xf1] sm:$0xff] }
 0x11e   : > { %5068 = vmatpush3.bf16.msra.mxu1 %v5784_v15  ;;  %5263 = vmatprep.subr.bf16.mxu0 %v5783_v52  ;;  %v1768_v15 = vld [vmem:[#allocation2 + $0xe0] sm:$0xff] }
 0x11f   : > { %5069 = vmatprep.subr.bf16.mxu1 %v5785_v30 }
 0x121   : > { %5038 = vmatmul.mubr.bf16.gmra.mrb[8].mxu1 %v6661_v46  ;;  %5264 = vmatpush3.bf16.msra.mxu0 %v5783_v52  ;;  %v5790_v46 = vld [vmem:[#allocation7 + $0xf8] sm:$0xff]   ;;  %v5797_v52 = vld [vmem:[#allocation7 + $0x230] sm:$0xff]  }
 0x122   : > { %5041 = vmatprep.mubr.bf16.mxu1 %v6667_v1  ;;  %5070 = vmatpush3.bf16.msra.mxu1 %v5785_v30  ;;  %v3232_v1 = vld [vmem:[#allocation2 + $0x31] sm:$0xff]  ;;  %v3249_v30 = vld [vmem:[#allocation2 + $0xf9] sm:$0xff] }
 0x123   : > { %5071 = vmatprep.subr.bf16.mxu1 %v5787_v16  ;;  %5265 = vmatprep.subr.bf16.mxu0 %v5786_v3 }
 0x124   : > { %5234 = vmatmul.mubr.bf16.gmra.mrb[12].mxu0 %v6579_v51  ;;  %v2891_v51 = vld [vmem:[#allocation2 + $0x188] sm:$0xff] }
 0x125   : > { %5237 = vmatprep.mubr.bf16.mxu0 %v6587_v4  ;;  %5266 = vmatpush3.bf16.msra.mxu0 %v5786_v3  ;;  %v6742_v4 = vpack.c.bf16 %v2891_v51, %v2890_v58  ;;  %v3271_v3 = vpack.c.bf16 %v3247_v20, %v3246_v45  ;;  %v1770_v58 = vld [vmem:[#allocation2 + $0xf8] sm:$0xff]  ;;  %v3250_v51 = vld [vmem:[#allocation2 + $0x109] sm:$0xff] }
 0x126   : > { %5072 = vmatpush3.bf16.msra.mxu1 %v5787_v16  ;;  %5267 = vmatprep.subr.bf16.mxu0 %v5789_v32  ;;  %v1790_v16 = vpack.c.bf16 %v1766_v10, %v1765_v61  ;;  %v3605_v61 = vld [vmem:[#allocation2 + $0x52] sm:$0xff]  ;;  %v3606_v10 = vld [vmem:[#allocation2 + $0x62] sm:$0xff]  ;;  %v3607_v45 = vld [vmem:[#allocation2 + $0x6a] sm:$0xff] }
 0x127   : > { %5073 = vmatprep.subr.bf16.mxu1 %v5788_v13 }
 0x129   : > { %5042 = vmatmul.mubr.bf16.gmra.mrb[12].mxu1 %v6669_v36  ;;  %5268 = vmatpush3.bf16.msra.mxu0 %v5789_v32  ;;  %v5807_v36 = vld [vmem:[#allocation2] sm:$0xff]  ;;  %v3272_v32 = vpack.c.bf16 %v3249_v30, %v3248_v35  ;;  %v3610_v30 = vld [vmem:[#allocation2 + $0x92] sm:$0xff] }
 0x12a   : > { %5045 = vmatprep.mubr.bf16.mxu1 %v6675_v14  ;;  %5074 = vmatpush3.bf16.msra.mxu1 %v5788_v13  ;;  %v2909_v14 = vpack.c.bf16 %v5807_v36, %v5807_v36  ;;  %v1791_v13 = vpack.c.bf16 %v1768_v15, %v1767_v21  ;;  %v3253_v36 = vld [vmem:[#allocation2 + $0x129] sm:$0xff]  ;;  %v3636_v21 = vpack.c.bf16 %v3607_v45, %v3606_v10  ;;  %v3608_v15 = vld [vmem:[#allocation2 + $0x7a] sm:$0xff] }
 0x12b   : > { %5075 = vmatprep.subr.bf16.mxu1 %v5790_v46  ;;  %5301 = vmatprep.subr.bf16.mxu0 %v5791_v19  ;;  %v3609_v35 = vld [vmem:[#allocation2 + $0x82] sm:$0xff] }
 0x12c   : > { %5238 = vmatmul.mubr.bf16.gmra.mrb[16].mxu0 %v6600_v8  ;;  %v1751_v8 = vld [vmem:[#allocation2 + $0x18] sm:$0xff] }
 0x12d   : > { %5241 = vmatprep.mubr.bf16.mxu0 %v6608_v18  ;;  %v1752_v18 = vld [vmem:[#allocation2 + $0x20] sm:$0xff] }
 0x12e   : > { %5076 = vmatpush3.bf16.msra.mxu1 %v5790_v46  ;;  %v5798_v46 = vld [vmem:[#allocation7 + $0x238] sm:$0xff]  }
 0x131   : > { %5046 = vmatmul.mubr.bf16.gmra.mrb[16].mxu1 %v6677_v27  ;;  %v1783_v27 = vpack.c.bf16 %v1752_v18, %v1751_v8  ;;  %v3251_v8 = vld [vmem:[#allocation2 + $0x111] sm:$0xff]  ;;  %v1771_v18 = vld [vmem:[#allocation2 + $0x108] sm:$0xff] }
 0x132   : > { %5049 = vmatprep.mubr.bf16.mxu1 %v6683_v31  ;;  %v1759_v31 = vld [vmem:[#allocation2 + $0x78] sm:$0xff] }
 0x133   : > { %v1787_v0 = vpack.c.bf16 %v1760_v54, %v1759_v31 }
 0x134   : > { %5242 = vmatmul.mubr.bf16.gmra.mrb[20].mxu0 %v6620_v60  ;;  %v3233_v60 = vld [vmem:[#allocation2 + $0x39] sm:$0xff] }
 0x135   : > { %5245 = vmatprep.mubr.bf16.mxu0 %v6628_v39  ;;  %v3264_v39 = vpack.c.bf16 %v3233_v60, %v3232_v1  ;;  %v1772_v1 = vld [vmem:[#allocation2 + $0x110] sm:$0xff]  ;;  %v3252_v60 = vld [vmem:[#allocation2 + $0x121] sm:$0xff] }
 0x136   : > { %v3274_v7 = vpack.c.bf16 %v3253_v36, %v3252_v60 }
 0x139   : > { %5050 = vmatmul.mubr.bf16.gmra.mrb[20].mxu1 %v6685_v29 }
 0x13a   : > { %5053 = vmatprep.mubr.bf16.mxu1 %v6691_v37 }
 0x13c   : > { %5246 = vmatmul.mubr.bf16.gmra.mrb[24].mxu0 %v6640_v24  ;;  %v3236_v24 = vld [vmem:[#allocation2 + $0x61] sm:$0xff] }
 0x13d   : > { %5249 = vmatprep.mubr.bf16.mxu0 %v6742_v4  ;;  %v3266_v17 = vpack.c.bf16 %v3237_v56, %v3236_v24  ;;  %v1774_v24 = vld [vmem:[#allocation2 + $0x128] sm:$0xff]  ;;  %v3254_v56 = vld [vmem:[#allocation2 + $0x139] sm:$0xff] }
 0x13e   : > { %v1794_v31 = vpack.c.bf16 %v1774_v24, %v1773_v53  ;;  %v5801_v53 = vld [vmem:[#allocation9 + $0x10] sm:$0xff]  }
 0x13f   : > { %v5805_v24 = vld [vmem:[#allocation9 + $0x30] sm:$0xff]  }
 0x141   : > { %5054 = vmatmul.mubr.bf16.gmra.mrb[24].mxu1 %v6693_v40 }
 0x142   : > { %5057 = vmatprep.mubr.bf16.mxu1 %v6699_v47 }
 0x144   : > { %5250 = vmatmul.mubr.bf16.gmra.mrb[28].mxu0 %v2909_v14 }
 0x145   : > { %5269 = vmatprep.mubr.bf16.mxu0 %v3264_v39  ;;  %v1793_v39 = vpack.c.bf16 %v1772_v1, %v1771_v18  ;;  %v3618_v18 = vld [vmem:[#allocation2 + $0xf2] sm:$0xff]  ;;  %v3619_v1 = vld [vmem:[#allocation2 + $0xfa] sm:$0xff] }
 0x146   : > { %v3642_v36 = vpack.c.bf16 %v3619_v1, %v3618_v18 }
 0x149   : > { %5058 = vmatmul.mubr.bf16.gmra.mrb[28].mxu1 %v6701_v49 }
 0x14a   : > { %5077 = vmatprep.mubr.bf16.mxu1 %v1783_v27  ;;  %v3273_v27 = vpack.c.bf16 %v3251_v8, %v3250_v51  ;;  %v3616_v51 = vld [vmem:[#allocation2 + $0xda] sm:$0xff]  ;;  %v3617_v8 = vld [vmem:[#allocation2 + $0xe2] sm:$0xff] }
 0x14b   : > { %v3641_v60 = vpack.c.bf16 %v3617_v8, %v3616_v51 }
 0x14c   : > { %5270 = vmatmul.mubr.bf16.vlgmr.msra.gmra.mrb[0].mxu0 %v3265_v62  ;;  %v3255_v62 = vld [vmem:[#allocation2 + $0x141] sm:$0xff] }
 0x14d   : > { %5302 = vmatpush3.bf16.msra.mxu0 %v5791_v19  ;;  %5273 = vmatprep.mubr.bf16.mxu0 %v3266_v17  ;;  %v1769_v19 = vld [vmem:[#allocation2 + $0xf0] sm:$0xff]  ;;  %v1775_v17 = vld [vmem:[#allocation2 + $0x138] sm:$0xff]  ;;  %v3275_v54 = vpack.c.bf16 %v3255_v62, %v3254_v56 }
 0x14e   : > { %5303 = vmatprep.subr.bf16.mxu0 %v5792_v6  ;;  %v1792_v14 = vpack.c.bf16 %v1770_v58, %v1769_v19 }
 0x151   : > { %5078 = vmatmul.mubr.bf16.vlgmr.msra.gmra.mrb[0].mxu1 %v6709_v50  ;;  %5304 = vmatpush3.bf16.msra.mxu0 %v5792_v6  ;;  %v3245_v50 = vld [vmem:[#allocation2 + $0xc9] sm:$0xff]  ;;  %v1776_v6 = vld [vmem:[#allocation2 + $0x140] sm:$0xff] }
 0x152   : > { %5081 = vmatprep.mubr.bf16.mxu1 %v6714_v48  ;;  %5305 = vmatprep.subr.bf16.mxu0 %v5793_v34  ;;  %v3270_v48 = vpack.c.bf16 %v3245_v50, %v3244_v38  ;;  %v1795_v5 = vpack.c.bf16 %v1776_v6, %v1775_v17  ;;  %v3278_v38 = vpack.c.bf16 %v3261_v59, %v3260_v12  ;;  %v3262_v50 = vld [vmem:[#allocation2 + $0x199] sm:$0xff] }
 0x154   : > { %5274 = vmatmul.mubr.bf16.gmra.mrb[4].mxu0 %v3267_v2  ;;  %v1778_v2 = vld [vmem:[#allocation2 + $0x158] sm:$0xff] }
 0x155   : > { %5277 = vmatprep.mubr.bf16.mxu0 %v3268_v41  ;;  %5306 = vmatpush3.bf16.msra.mxu0 %v5793_v34  ;;  %v1777_v34 = vld [vmem:[#allocation2 + $0x150] sm:$0xff] }
 0x156   : > { %5307 = vmatprep.subr.bf16.mxu0 %v5794_v44  ;;  %v3259_v41 = vld [vmem:[#allocation2 + $0x171] sm:$0xff]  ;;  %v1796_v33 = vpack.c.bf16 %v1778_v2, %v1777_v34 }
 0x159   : > { %5082 = vmatmul.mubr.bf16.gmra.mrb[4].mxu1 %v6716_v55  ;;  %5308 = vmatpush3.bf16.msra.mxu0 %v5794_v44  ;;  %v5796_v55 = vld [vmem:[#allocation7 + $0x228] sm:$0xff]   ;;  %v1779_v44 = vld [vmem:[#allocation2 + $0x168] sm:$0xff] }
 0x15a   : > { %5085 = vmatprep.mubr.bf16.mxu1 %v1787_v0  ;;  %5309 = vmatprep.subr.bf16.mxu0 %v5795_v28  ;;  %v3258_v0 = vld [vmem:[#allocation2 + $0x169] sm:$0xff]  ;;  %v1797_v42 = vpack.c.bf16 %v1780_v22, %v1779_v44 }
 0x15b   : > { %v3277_v23 = vpack.c.bf16 %v3259_v41, %v3258_v0 }
 0x15c   : > { %5278 = vmatmul.mubr.bf16.gmra.mrb[8].mxu0 %v3269_v26  ;;  %v3603_v26 = vld [vmem:[#allocation2 + $0x3a] sm:$0xff] }
 0x15d   : > { %5281 = vmatprep.mubr.bf16.mxu0 %v3270_v48  ;;  %5310 = vmatpush3.bf16.msra.mxu0 %v5795_v28  ;;  %v3263_v28 = vld [vmem:[#allocation2 + $0x1a1] sm:$0xff] }
 0x15e   : > { %5311 = vmatprep.subr.bf16.mxu0 %v5796_v55 }
 0x161   : > { %5086 = vmatmul.mubr.bf16.gmra.mrb[8].mxu1 %v1788_v63  ;;  %5312 = vmatpush3.bf16.msra.mxu0 %v5796_v55  ;;  %v3602_v63 = vld [vmem:[#allocation2 + $0x32] sm:$0xff]  ;;  %v3604_v55 = vld [vmem:[#allocation2 + $0x4a] sm:$0xff] }
 0x162   : > { %5089 = vmatprep.mubr.bf16.mxu1 %v1789_v57  ;;  %5313 = vmatprep.subr.bf16.mxu0 %v5797_v52  ;;  %v3279_v57 = vpack.c.bf16 %v3263_v28, %v3262_v50  ;;  %v3634_v48 = vpack.c.bf16 %v3603_v26, %v3602_v63  ;;  %v3635_v20 = vpack.c.bf16 %v3605_v61, %v3604_v55 }
 0x164   : > { %5282 = vmatmul.mubr.bf16.gmra.mrb[12].mxu0 %v3271_v3 }
 0x165   : > { %5285 = vmatprep.mubr.bf16.mxu0 %v3272_v32  ;;  %5314 = vmatpush3.bf16.msra.mxu0 %v5797_v52  ;;  %v3611_v52 = vld [vmem:[#allocation2 + $0x9a] sm:$0xff]  ;;  %v3614_v32 = vld [vmem:[#allocation2 + $0xc2] sm:$0xff] }
 0x166   : > { %5315 = vmatprep.subr.bf16.mxu0 %v5798_v46  ;;  %v3638_v3 = vpack.c.bf16 %v3611_v52, %v3610_v30 }
 0x169   : > { %5090 = vmatmul.mubr.bf16.gmra.mrb[12].mxu1 %v1790_v16  ;;  %5316 = vmatpush3.bf16.msra.mxu0 %v5798_v46  ;;  %v3637_v16 = vpack.c.bf16 %v3609_v35, %v3608_v15  ;;  %v3615_v46 = vld [vmem:[#allocation2 + $0xca] sm:$0xff]  ;;  %v6815_v35 = vld [vmem:[%s7103_s5] ss:$0 sm:$0xff] }
 0x16a   : > { %5093 = vmatprep.mubr.bf16.mxu1 %v1791_v13  ;;  %v3612_v13 = vld [vmem:[#allocation2 + $0xaa] sm:$0xff]  ;;  %v3640_v58 = vpack.c.bf16 %v3615_v46, %v3614_v32 }
 0x16c   : > { %5286 = vmatmul.mubr.bf16.gmra.mrb[16].mxu0 %v3273_v27  ;;  %v5800_v27 = vld [vmem:[#allocation9 + $0x8] sm:$0xff]  }
 0x16d   : > { %5289 = vmatprep.mubr.bf16.mxu0 %v3274_v7  ;;  %v3633_v7 = vld [vmem:[#allocation2 + $0x1a2] sm:$0xff] }
 0x171   : > { %5094 = vmatmul.mubr.bf16.gmra.mrb[16].mxu1 %v1792_v14  ;;  %v5799_v14 = vld [vmem:[#allocation9] sm:$0xff]  }
 0x172   : > { %5097 = vmatprep.mubr.bf16.mxu1 %v1793_v39  ;;  %5349 = vmatprep.subr.bf16.mxu1 %v5799_v14  ;;  %v3632_v39 = vld [vmem:[#allocation2 + $0x19a] sm:$0xff] }
 0x173   : > { %5350 = vmatpush3.bf16.msra.mxu1 %v5799_v14 }
 0x174   : > { %5290 = vmatmul.mubr.bf16.gmra.mrb[20].mxu0 %v3275_v54  ;;  %5351 = vmatprep.subr.bf16.mxu1 %v5800_v27 }
 0x175   : > { %5293 = vmatprep.mubr.bf16.mxu0 %v3276_v9 }
 0x177   : > { %5352 = vmatpush3.bf16.msra.mxu1 %v5800_v27 }
 0x178   : > { %5353 = vmatprep.subr.bf16.mxu1 %v5801_v53 }
 0x179   : > { %5098 = vmatmul.mubr.bf16.gmra.mrb[20].mxu1 %v1794_v31 }
 0x17a   : > { %5101 = vmatprep.mubr.bf16.mxu1 %v1795_v5 }
 0x17b   : > { %5354 = vmatpush3.bf16.msra.mxu1 %v5801_v53 }
 0x17c   : > { %5294 = vmatmul.mubr.bf16.gmra.mrb[24].mxu0 %v3277_v23 }
 0x17d   : > { %5297 = vmatprep.mubr.bf16.mxu0 %v3278_v38 }
 0x181   : > { %5102 = vmatmul.mubr.bf16.gmra.mrb[24].mxu1 %v1796_v33 }
 0x182   : > { %5105 = vmatprep.mubr.bf16.mxu1 %v1797_v42 }
 0x184   : > { %5298 = vmatmul.mubr.bf16.gmra.mrb[28].mxu0 %v3279_v57 }
 0x185   : > { %5317 = vmatprep.mubr.bf16.mxu0 %v3634_v48 }
 0x189   : > { %5106 = vmatmul.mubr.bf16.gmra.mrb[28].mxu1 %v6742_v4  ;;  %v3613_v4 = vld [vmem:[#allocation2 + $0xb2] sm:$0xff] }
 0x18a   : > { %v3639_v19 = vpack.c.bf16 %v3613_v4, %v3612_v13  ;;  %v6821_v4 = vld [vmem:[%s7104_s6] ss:$0 sm:$0xff] }
 0x18c   : > { %5318 = vmatmul.mubr.bf16.vlgmr.msra.gmra.mrb[0].mxu0 %v3635_v20  ;;  %v6810_v20 = vld [vmem:[%s7102_s4] ss:$0 sm:$0xff] }
 0x18d   : > { %5321 = vmatprep.mubr.bf16.mxu0 %v3636_v21 }
 0x194   : > { %5322 = vmatmul.mubr.bf16.gmra.mrb[4].mxu0 %v3637_v16 }
 0x195   : > { %5325 = vmatprep.mubr.bf16.mxu0 %v3638_v3 }
 0x19c   : > { %5326 = vmatmul.mubr.bf16.gmra.mrb[8].mxu0 %v3639_v19 }
 0x19d   : > { %5329 = vmatprep.mubr.bf16.mxu0 %v3640_v58 }
 0x1a4   : > { %5330 = vmatmul.mubr.bf16.gmra.mrb[12].mxu0 %v3641_v60 }
 0x1a5   : > { %5333 = vmatprep.mubr.bf16.mxu0 %v3642_v36 }
 0x1ac   : > { %5334 = vmatmul.mubr.bf16.gmra.mrb[16].mxu0 %v6685_v29  ;;  %v3649_v29 = vpack.c.bf16 %v3633_v7, %v3632_v39 }
 0x1ad   : > { %5337 = vmatprep.mubr.bf16.mxu0 %v6691_v37  ;;  %v5802_v37 = vld [vmem:[#allocation9 + $0x18] sm:$0xff]  }
 0x1ae   : > { %5355 = vmatprep.subr.bf16.mxu1 %v5802_v37 }
 0x1af   : > { %5356 = vmatpush3.bf16.msra.mxu1 %v5802_v37 }
 0x1b4   : > { %5338 = vmatmul.mubr.bf16.gmra.mrb[20].mxu0 %v6693_v40  ;;  %v5803_v40 = vld [vmem:[#allocation9 + $0x20] sm:$0xff]  }
 0x1b5   : > { %5341 = vmatprep.mubr.bf16.mxu0 %v6699_v47  ;;  %5357 = vmatprep.subr.bf16.mxu1 %v5803_v40  ;;  %v5804_v47 = vld [vmem:[#allocation9 + $0x28] sm:$0xff]  }
 0x1b6   : > { %5358 = vmatpush3.bf16.msra.mxu1 %v5803_v40 }
 0x1b7   : > { %5359 = vmatprep.subr.bf16.mxu1 %v5804_v47 }
 0x1ba   : > { %5360 = vmatpush3.bf16.msra.mxu1 %v5804_v47 }
 0x1bb   : > { %5361 = vmatprep.subr.bf16.mxu1 %v5805_v24 }
 0x1bc   : > { %5342 = vmatmul.mubr.bf16.gmra.mrb[24].mxu0 %v6701_v49  ;;  %v5806_v49 = vld [vmem:[#allocation9 + $0x38] sm:$0xff]  }
 0x1bd   : > { %5345 = vmatprep.mubr.bf16.mxu0 %v6707_v43 }
 0x1be   : > { %5362 = vmatpush3.bf16.msra.mxu1 %v5805_v24 }
 0x1bf   : > { %5363 = vmatprep.subr.bf16.mxu1 %v5806_v49 }
 0x1c2   : > { %5364 = vmatpush3.bf16.msra.mxu1 %v5806_v49 }
 0x1c4   : > { %5346 = vmatmul.mubr.bf16.gmra.mrb[28].mxu0 %v3649_v29 }
 0x224   : > { %v5079_v43 = vpop.f32.mrb[0].mxu1 }
 0x225   : > { %v1930_v56 = vpop.f32.mrb[1].mxu1 }
 0x226   : > { %v5080_v62 = vpop.f32.mrb[2].mxu1 }
 0x227   : > { %v1933_v17 = vpop.f32.mrb[3].mxu1 }
 0x22c   : > { %v5083_v6 = vpop.f32.mrb[4].mxu1 }
 0x22d   : > { %v1946_v11 = vpop.f32.mrb[5].mxu1 }
 0x22e   : > { %v5084_v25 = vpop.f32.mrb[6].mxu1 }
 0x22f   : > { %v1949_v31 = vpop.f32.mrb[7].mxu1 }
 0x234   : > { %v6759_v54 = vpop.f32.mrb[8].mxu1 }
 0x235   : > { %v6761_v5 = vpop.f32.mrb[9].mxu1 }
 0x236   : > { %v6763_v9 = vpop.f32.mrb[10].mxu1 }
 0x237   : > { %v6765_v34 = vpop.f32.mrb[11].mxu1 }
 0x23c   : > { %v6767_v2 = vpop.f32.mrb[12].mxu1 }
 0x23d   : > { %v6769_v0 = vpop.f32.mrb[13].mxu1 }
 0x23e   : > { %v6771_v41 = vpop.f32.mrb[14].mxu1 }
 0x23f   : > { %v6773_v44 = vpop.f32.mrb[15].mxu1 }
 0x244   : > { %v6775_v22 = vpop.f32.mrb[16].mxu1 }
 0x245   : > { %v6777_v12 = vpop.f32.mrb[17].mxu1 }
 0x246   : > { %v6779_v59 = vpop.f32.mrb[18].mxu1 }
 0x247   : > { %v6781_v33 = vpop.f32.mrb[19].mxu1 }
 0x24c   : > { %v6783_v23 = vpop.f32.mrb[20].mxu1 }
 0x24d   : > { %v6785_v42 = vpop.f32.mrb[21].mxu1 }
 0x24e   : > { %v6787_v38 = vpop.f32.mrb[22].mxu1 }
 0x24f   : > { %v6789_v50 = vpop.f32.mrb[23].mxu1 }
 0x254   : > { %v6791_v28 = vpop.f32.mrb[24].mxu1 }
 0x255   : > { %v6793_v63 = vpop.f32.mrb[25].mxu1 }
 0x256   : > { %v6795_v26 = vpop.f32.mrb[26].mxu1 }
 0x257   : > { %v6797_v57 = vpop.f32.mrb[27].mxu1 }
 0x25c   : > { %v6799_v48 = vpop.f32.mrb[28].mxu1 }
 0x25d   : > { %v6801_v55 = vpop.f32.mrb[29].mxu1 }
 0x25e   : > { %v6803_v61 = vpop.f32.mrb[30].mxu1 }
 0x25f   : > { %v6805_v10 = vpop.f32.mrb[31].mxu1  ;;  %v5319_v45 = vpop.f32.mrb[0].mxu0 }
 0x260   : > { %v5397_v21 = vadd.f32 %v5319_v45, %v5079_v43  ;;  %v3781_v15 = vpop.f32.mrb[1].mxu0 }
 0x261   : > { %v5398_v30 = vadd.f32 %v3781_v15, %v1930_v56  ;;  %v5320_v52 = vpop.f32.mrb[2].mxu0 }
 0x262   : > { %v4013_v16 = vadd.f32 %v5397_v21, %v6810_v20  ;;  %v5399_v3 = vadd.f32 %v5320_v52, %v5080_v62  ;;  %v3784_v13 = vpop.f32.mrb[3].mxu0 }
 0x263   : > { %v4011_v32 = vadd.f32 %v5398_v30, %v6810_v20  ;;  %v5400_v46 = vadd.f32 %v3784_v13, %v1933_v17 }
 0x264   : > { %v4052_v19 = vmul.f32 %v6815_v35, %v4013_v16  ;;  %v4014_v58 = vadd.f32 %v5399_v3, %v6810_v20 }
 0x265   : > { %v4050_v51 = vmul.f32 %v6815_v35, %v4011_v32  ;;  %v4012_v8 = vadd.f32 %v5400_v46, %v6810_v20 }
 0x266   : > { %v4091_v18 = vadd.f32 %v6821_v4, %v4052_v19  ;;  %v4053_v1 = vmul.f32 %v6815_v35, %v4014_v58 }
 0x267   : > { %v4051_v60 = vmul.f32 %v6815_v35, %v4012_v8  ;;  %v5323_v36 = vpop.f32.mrb[4].mxu0  ;;  %v4089_v14 = vadd.f32 %v6821_v4, %v4050_v51 }
 0x268   : > { %v4092_v27 = vadd.f32 %v6821_v4, %v4053_v1  ;;  %v5401_v39 = vadd.f32 %v5323_v36, %v5083_v6  ;;  %v3797_v7 = vpop.f32.mrb[5].mxu0  ;;  %v4123_v40 = vmax.f32 %v4091_v18, 0.0 }
 0x269   : > { %v5402_v53 = vadd.f32 %v3797_v7, %v1946_v11  ;;  %v5324_v29 = vpop.f32.mrb[6].mxu0  ;;  %v4090_v37 = vadd.f32 %v6821_v4, %v4051_v60  ;;  %v4121_v17 = vmax.f32 %v4089_v14, 0.0 }
 0x26a   : > { %v4124_v47 = vmax.f32 %v4092_v27, 0.0  ;;  %v4017_v24 = vadd.f32 %v5401_v39, %v6810_v20  ;;  %v5403_v49 = vadd.f32 %v5324_v29, %v5084_v25  ;;  %v3800_v43 = vpop.f32.mrb[7].mxu0 }
 0x26b   : > { %v4015_v56 = vadd.f32 %v5402_v53, %v6810_v20  ;;  %v5404_v62 = vadd.f32 %v3800_v43, %v1949_v31  ;;  %v4122_v45 = vmax.f32 %v4090_v37, 0.0 }
 0x26c   : > { %v4154_v21 = vpack.c.bf16 %v4124_v47, %v4123_v40  ;;  %v4056_v15 = vmul.f32 %v6815_v35, %v4017_v24  ;;  %v4018_v6 = vadd.f32 %v5403_v49, %v6810_v20 }
 0x26d   : > { %v4054_v11 = vmul.f32 %v6815_v35, %v4015_v56  ;;  %v4016_v30 = vadd.f32 %v5404_v62, %v6810_v20  ;;  %v4153_v52 = vpack.c.bf16 %v4122_v45, %v4121_v17 }
 0x26e   : > { %v4057_v16 = vmul.f32 %v6815_v35, %v4018_v6  ;;  %v4095_v25 = vadd.f32 %v6821_v4, %v4056_v15 }
 0x26f   : > { %v4055_v3 = vmul.f32 %v6815_v35, %v4016_v30  ;;  %v5327_v13 = vpop.f32.mrb[8].mxu0  ;;  %5365 = vmatprep.mubr.bf16.mxu1 %v4153_v52  ;;  %v4093_v31 = vadd.f32 %v6821_v4, %v4054_v11 }
 0x270   : > { %v5405_v32 = vadd.f32 %v5327_v13, %v6759_v54  ;;  %v3813_v46 = vpop.f32.mrb[9].mxu0  ;;  %5366 = vmatmul.mubr.bf16.vlgmr.msra.gmra.mrb[32].mxu1 %v4154_v21  ;;  %v4096_v19 = vadd.f32 %v6821_v4, %v4057_v16  ;;  %v4127_v36 = vmax.f32 %v4095_v25, 0.0 }
 0x271   : > { %v5406_v58 = vadd.f32 %v3813_v46, %v6761_v5  ;;  %v5328_v51 = vpop.f32.mrb[10].mxu0  ;;  %v4094_v8 = vadd.f32 %v6821_v4, %v4055_v3  ;;  %v4125_v39 = vmax.f32 %v4093_v31, 0.0 }
 0x272   : > { %v4021_v18 = vadd.f32 %v5405_v32, %v6810_v20  ;;  %v5407_v1 = vadd.f32 %v5328_v51, %v6763_v9  ;;  %v3816_v60 = vpop.f32.mrb[11].mxu0  ;;  %v4128_v14 = vmax.f32 %v4096_v19, 0.0 }
 0x273   : > { %v4019_v27 = vadd.f32 %v5406_v58, %v6810_v20  ;;  %v5408_v54 = vadd.f32 %v3816_v60, %v6765_v34  ;;  %v4126_v7 = vmax.f32 %v4094_v8, 0.0 }
 0x274   : > { %v4060_v53 = vmul.f32 %v6815_v35, %v4021_v18  ;;  %v4022_v5 = vadd.f32 %v5407_v1, %v6810_v20  ;;  %v4156_v29 = vpack.c.bf16 %v4128_v14, %v4127_v36 }
 0x275   : > { %v4058_v37 = vmul.f32 %v6815_v35, %v4019_v27  ;;  %v4020_v40 = vadd.f32 %v5408_v54, %v6810_v20  ;;  %v4155_v47 = vpack.c.bf16 %v4126_v7, %v4125_v39 }
 0x276   : > { %v4061_v9 = vmul.f32 %v6815_v35, %v4022_v5  ;;  %v4099_v24 = vadd.f32 %v6821_v4, %v4060_v53 }
 0x277   : > { %v4059_v49 = vmul.f32 %v6815_v35, %v4020_v40  ;;  %v5331_v43 = vpop.f32.mrb[12].mxu0  ;;  %5369 = vmatprep.mubr.bf16.mxu1 %v4155_v47  ;;  %v4097_v34 = vadd.f32 %v6821_v4, %v4058_v37 }
 0x278   : > { %v5409_v56 = vadd.f32 %v5331_v43, %v6767_v2  ;;  %v3829_v62 = vpop.f32.mrb[13].mxu0  ;;  %5370 = vmatmul.mubr.bf16.gmra.mrb[36].mxu1 %v4156_v29  ;;  %v4100_v17 = vadd.f32 %v6821_v4, %v4061_v9  ;;  %v4131_v52 = vmax.f32 %v4099_v24, 0.0 }
 0x279   : > { %v5410_v45 = vadd.f32 %v3829_v62, %v6769_v0  ;;  %v5332_v21 = vpop.f32.mrb[14].mxu0  ;;  %v4098_v15 = vadd.f32 %v6821_v4, %v4059_v49  ;;  %v4129_v3 = vmax.f32 %v4097_v34, 0.0 }
 0x27a   : > { %v4025_v6 = vadd.f32 %v5409_v56, %v6810_v20  ;;  %v5411_v11 = vadd.f32 %v5332_v21, %v6771_v41  ;;  %v3832_v30 = vpop.f32.mrb[15].mxu0  ;;  %v4132_v16 = vmax.f32 %v4100_v17, 0.0 }
 0x27b   : > { %v4023_v25 = vadd.f32 %v5410_v45, %v6810_v20  ;;  %v5412_v2 = vadd.f32 %v3832_v30, %v6773_v44  ;;  %v4130_v13 = vmax.f32 %v4098_v15, 0.0 }
 0x27c   : > { %v4064_v31 = vmul.f32 %v6815_v35, %v4025_v6  ;;  %v4026_v0 = vadd.f32 %v5411_v11, %v6810_v20  ;;  %v4158_v32 = vpack.c.bf16 %v4132_v16, %v4131_v52 }
 0x27d   : > { %v4062_v46 = vmul.f32 %v6815_v35, %v4023_v25  ;;  %v4024_v19 = vadd.f32 %v5412_v2, %v6810_v20  ;;  %v4157_v58 = vpack.c.bf16 %v4130_v13, %v4129_v3 }
 0x27e   : > { %v4065_v41 = vmul.f32 %v6815_v35, %v4026_v0  ;;  %v4103_v51 = vadd.f32 %v6821_v4, %v4064_v31 }
 0x27f   : > { %v4063_v8 = vmul.f32 %v6815_v35, %v4024_v19  ;;  %v5335_v18 = vpop.f32.mrb[16].mxu0  ;;  %5373 = vmatprep.mubr.bf16.mxu1 %v4157_v58  ;;  %v4101_v44 = vadd.f32 %v6821_v4, %v4062_v46 }
 0x280   : > { %v5413_v1 = vadd.f32 %v5335_v18, %v6775_v22  ;;  %v3845_v60 = vpop.f32.mrb[17].mxu0  ;;  %5374 = vmatmul.mubr.bf16.gmra.mrb[40].mxu1 %v4158_v32  ;;  %v4104_v36 = vadd.f32 %v6821_v4, %v4065_v41  ;;  %v4135_v5 = vmax.f32 %v4103_v51, 0.0 }
 0x281   : > { %v5414_v14 = vadd.f32 %v3845_v60, %v6777_v12  ;;  %v5336_v27 = vpop.f32.mrb[18].mxu0  ;;  %v4102_v54 = vadd.f32 %v6821_v4, %v4063_v8  ;;  %v4133_v40 = vmax.f32 %v4101_v44, 0.0 }
 0x282   : > { %v4029_v39 = vadd.f32 %v5413_v1, %v6810_v20  ;;  %v5415_v7 = vadd.f32 %v5336_v27, %v6779_v59  ;;  %v3848_v53 = vpop.f32.mrb[19].mxu0  ;;  %v4136_v29 = vmax.f32 %v4104_v36, 0.0 }
 0x283   : > { %v4027_v37 = vadd.f32 %v5414_v14, %v6810_v20  ;;  %v5416_v22 = vadd.f32 %v3848_v53, %v6781_v33  ;;  %v4134_v47 = vmax.f32 %v4102_v54, 0.0 }
 0x284   : > { %v4068_v9 = vmul.f32 %v6815_v35, %v4029_v39  ;;  %v4030_v12 = vadd.f32 %v5415_v7, %v6810_v20  ;;  %v4160_v24 = vpack.c.bf16 %v4136_v29, %v4135_v5 }
 0x285   : > { %v4066_v49 = vmul.f32 %v6815_v35, %v4027_v37  ;;  %v4028_v43 = vadd.f32 %v5416_v22, %v6810_v20  ;;  %v4159_v34 = vpack.c.bf16 %v4134_v47, %v4133_v40 }
 0x286   : > { %v4069_v59 = vmul.f32 %v6815_v35, %v4030_v12  ;;  %v4107_v56 = vadd.f32 %v6821_v4, %v4068_v9 }
 0x287   : > { %v4067_v62 = vmul.f32 %v6815_v35, %v4028_v43  ;;  %v5339_v17 = vpop.f32.mrb[20].mxu0  ;;  %5377 = vmatprep.mubr.bf16.mxu1 %v4159_v34  ;;  %v4105_v33 = vadd.f32 %v6821_v4, %v4066_v49 }
 0x288   : > { %v5417_v45 = vadd.f32 %v5339_v17, %v6783_v23  ;;  %v3861_v21 = vpop.f32.mrb[21].mxu0  ;;  %5378 = vmatmul.mubr.bf16.gmra.mrb[44].mxu1 %v4160_v24  ;;  %v4108_v15 = vadd.f32 %v6821_v4, %v4069_v59  ;;  %v4139_v2 = vmax.f32 %v4107_v56, 0.0 }
 0x289   : > { %v5418_v6 = vadd.f32 %v3861_v21, %v6785_v42  ;;  %v5340_v11 = vpop.f32.mrb[22].mxu0  ;;  %v4106_v30 = vadd.f32 %v6821_v4, %v4067_v62  ;;  %v4137_v31 = vmax.f32 %v4105_v33, 0.0 }
 0x28a   : > { %v4033_v52 = vadd.f32 %v5417_v45, %v6810_v20  ;;  %v5419_v16 = vadd.f32 %v5340_v11, %v6787_v38  ;;  %v3864_v25 = vpop.f32.mrb[23].mxu0  ;;  %v4140_v3 = vmax.f32 %v4108_v15, 0.0 }
 0x28b   : > { %v4031_v13 = vadd.f32 %v5418_v6, %v6810_v20  ;;  %v5420_v23 = vadd.f32 %v3864_v25, %v6789_v50  ;;  %v4138_v0 = vmax.f32 %v4106_v30, 0.0 }
 0x28c   : > { %v4072_v32 = vmul.f32 %v6815_v35, %v4033_v52  ;;  %v4034_v42 = vadd.f32 %v5419_v16, %v6810_v20  ;;  %v4162_v46 = vpack.c.bf16 %v4140_v3, %v4139_v2 }
 0x28d   : > { %v4070_v19 = vmul.f32 %v6815_v35, %v4031_v13  ;;  %v4032_v58 = vadd.f32 %v5420_v23, %v6810_v20  ;;  %v4161_v41 = vpack.c.bf16 %v4138_v0, %v4137_v31 }
 0x28e   : > { %v4073_v38 = vmul.f32 %v6815_v35, %v4034_v42  ;;  %v4111_v51 = vadd.f32 %v6821_v4, %v4072_v32 }
 0x28f   : > { %v4071_v8 = vmul.f32 %v6815_v35, %v4032_v58  ;;  %v5343_v18 = vpop.f32.mrb[24].mxu0  ;;  %5381 = vmatprep.mubr.bf16.mxu1 %v4161_v41  ;;  %v4109_v50 = vadd.f32 %v6821_v4, %v4070_v19 }
 0x290   : > { %v5421_v44 = vadd.f32 %v5343_v18, %v6791_v28  ;;  %v3877_v1 = vpop.f32.mrb[25].mxu0  ;;  %5382 = vmatmul.mubr.bf16.gmra.mrb[48].mxu1 %v4162_v46  ;;  %v4112_v60 = vadd.f32 %v6821_v4, %v4073_v38  ;;  %v4143_v53 = vmax.f32 %v4111_v51, 0.0 }
 0x291   : > { %v5422_v36 = vadd.f32 %v3877_v1, %v6793_v63  ;;  %v5344_v14 = vpop.f32.mrb[26].mxu0  ;;  %v4110_v27 = vadd.f32 %v6821_v4, %v4071_v8  ;;  %v4141_v37 = vmax.f32 %v4109_v50, 0.0  ;;  %v5808_v1 = vld [vmem:[%s6238_s22 + $0x10] sm:$0xff] }
 0x292   : > { %v4037_v54 = vadd.f32 %v5421_v44, %v6810_v20  ;;  %v5423_v39 = vadd.f32 %v5344_v14, %v6795_v26  ;;  %v3880_v7 = vpop.f32.mrb[27].mxu0  ;;  %v4144_v5 = vmax.f32 %v4112_v60, 0.0 }
 0x293   : > { %v4035_v29 = vadd.f32 %v5422_v36, %v6810_v20  ;;  %v5424_v28 = vadd.f32 %v3880_v7, %v6797_v57  ;;  %v4142_v22 = vmax.f32 %v4110_v27, 0.0  ;;  %v5809_v27 = vld [vmem:[%s6238_s22] sm:$0xff]  ;;  %v5810_v7 = vld [vmem:[%s6238_s22 + $0x18] sm:$0xff] }
 0x294   : > { %v4076_v40 = vmul.f32 %v6815_v35, %v4037_v54  ;;  %v4038_v63 = vadd.f32 %v5423_v39, %v6810_v20  ;;  %v4164_v47 = vpack.c.bf16 %v4144_v5, %v4143_v53  ;;  %v5811_v5 = vld [vmem:[%s6238_s22 + $0x8] sm:$0xff] }
 0x295   : > { %v4074_v9 = vmul.f32 %v6815_v35, %v4035_v29  ;;  %v4036_v12 = vadd.f32 %v5424_v28, %v6810_v20  ;;  %v4163_v24 = vpack.c.bf16 %v4142_v22, %v4141_v37 }
 0x296   : > { %v4077_v26 = vmul.f32 %v6815_v35, %v4038_v63  ;;  %v4115_v49 = vadd.f32 %v6821_v4, %v4076_v40 }
 0x297   : > { %v4075_v43 = vmul.f32 %v6815_v35, %v4036_v12  ;;  %v5347_v34 = vpop.f32.mrb[28].mxu0  ;;  %5385 = vmatprep.mubr.bf16.mxu1 %v4163_v24  ;;  %v4113_v57 = vadd.f32 %v6821_v4, %v4074_v9 }
 0x298   : > { %v5425_v59 = vadd.f32 %v5347_v34, %v6799_v48  ;;  %v3893_v56 = vpop.f32.mrb[29].mxu0  ;;  %5386 = vmatmul.mubr.bf16.gmra.mrb[52].mxu1 %v4164_v47  ;;  %v4116_v62 = vadd.f32 %v6821_v4, %v4077_v26  ;;  %v4147_v11 = vmax.f32 %v4115_v49, 0.0  ;;  %v5812_v47 = vld [vmem:[%s6238_s22 + $0x30] sm:$0xff]  ;;  %v5813_v26 = vld [vmem:[%s6238_s22 + $0x20] sm:$0xff]  ;;  %v5814_v34 = vld [vmem:[%s6238_s22 + $0x38] sm:$0xff] }
 0x299   : > { %v5426_v17 = vadd.f32 %v3893_v56, %v6801_v55  ;;  %v5348_v33 = vpop.f32.mrb[30].mxu0  ;;  %v4114_v45 = vadd.f32 %v6821_v4, %v4075_v43  ;;  %v4145_v16 = vmax.f32 %v4113_v57, 0.0 }
 0x29a   : > { %v4041_v21 = vadd.f32 %v5425_v59, %v6810_v20  ;;  %v5427_v15 = vadd.f32 %v5348_v33, %v6803_v61  ;;  %v3896_v6 = vpop.f32.mrb[31].mxu0  ;;  %v4148_v30 = vmax.f32 %v4116_v62, 0.0  ;;  %v5815_v59 = vld [vmem:[%s6238_s22 + $0x28] sm:$0xff] }
 0x29b   : > { %v4039_v52 = vadd.f32 %v5426_v17, %v6810_v20  ;;  %v5428_v48 = vadd.f32 %v3896_v6, %v6805_v10  ;;  %v4146_v25 = vmax.f32 %v4114_v45, 0.0 }
 0x29c   : > { %v4080_v2 = vmul.f32 %v6815_v35, %v4041_v21  ;;  %v4042_v55 = vadd.f32 %v5427_v15, %v6810_v20  ;;  %v4166_v3 = vpack.c.bf16 %v4148_v30, %v4147_v11  ;;  %v5816_v15 = vld [vmem:[%s6238_s22 + $0x50] sm:$0xff] }
 0x29d   : > { %v4078_v13 = vmul.f32 %v6815_v35, %v4039_v52  ;;  %v4040_v23 = vadd.f32 %v5428_v48, %v6810_v20  ;;  %v4165_v31 = vpack.c.bf16 %v4146_v25, %v4145_v16  ;;  %v5817_v52 = vld [vmem:[%s6238_s22 + $0x40] sm:$0xff]  ;;  %v5818_v25 = vld [vmem:[%s6238_s22 + $0x58] sm:$0xff] }
 0x29e   : > { %v4081_v61 = vmul.f32 %v6815_v35, %v4042_v55  ;;  %v4119_v0 = vadd.f32 %v6821_v4, %v4080_v2  ;;  %v5819_v55 = vld [vmem:[%s6238_s22 + $0x48] sm:$0xff] }
 0x29f   : > { %v4079_v32 = vmul.f32 %v6815_v35, %v4040_v23  ;;  %5389 = vmatprep.mubr.bf16.mxu1 %v4165_v31  ;;  %v4117_v10 = vadd.f32 %v6821_v4, %v4078_v13  ;;  %v6945_v35 = vld [vmem:[%s7106_s8] ss:$0 sm:$0xff] }
 0x2a0   : > { %5390 = vmatmul.mubr.bf16.gmra.mrb[56].mxu1 %v4166_v3  ;;  %v4120_v42 = vadd.f32 %v6821_v4, %v4081_v61  ;;  %v4151_v19 = vmax.f32 %v4119_v0, 0.0 }
 0x2a1   : > { %v4118_v46 = vadd.f32 %v6821_v4, %v4079_v32  ;;  %v4149_v41 = vmax.f32 %v4117_v10, 0.0  ;;  %v5820_v32 = vld [vmem:[%s6238_s22 + $0x70] sm:$0xff] }
 0x2a2   : > { %v4152_v58 = vmax.f32 %v4120_v42, 0.0 }
 0x2a3   : > { %v4150_v20 = vmax.f32 %v4118_v46, 0.0 }
 0x2a4   : > { %v4168_v38 = vpack.c.bf16 %v4152_v58, %v4151_v19  ;;  %v5821_v19 = vld [vmem:[%s6238_s22 + $0x60] sm:$0xff] }
 0x2a5   : > { %v4167_v51 = vpack.c.bf16 %v4150_v20, %v4149_v41  ;;  %v5822_v20 = vld [vmem:[%s6238_s22 + $0x78] sm:$0xff] }
 0x2a7   : > { %5393 = vmatprep.mubr.bf16.mxu1 %v4167_v51  ;;  %v5823_v51 = vld [vmem:[%s6238_s22 + $0x68] sm:$0xff] }
 0x2a8   : > { %5394 = vmatmul.mubr.bf16.gmra.mrb[60].mxu1 %v4168_v38 }
 0x343   : > { %v5367_v8 = vpop.f32.mrb[32].mxu1 }
 0x344   : > { %v4283_v18 = vadd.f32 %v5367_v8, %v6945_v35  ;;  %v4274_v4 = vpop.f32.mrb[33].mxu1 }
 0x345   : > { %v4275_v50 = vadd.f32 %v6945_v35, %v4274_v4  ;;  %v5368_v44 = vpop.f32.mrb[34].mxu1 }
 0x346   : > { %v4403_v60 = vadd.f32 %v5808_v1, %v4283_v18  ;;  %v4286_v36 = vadd.f32 %v5368_v44, %v6945_v35  ;;  %v4277_v14 = vpop.f32.mrb[35].mxu1 }
 0x347   : > { %v4401_v54 = vadd.f32 %v5809_v27, %v4275_v50  ;;  %v4278_v39 = vadd.f32 %v6945_v35, %v4277_v14 }
 0x348   : > { %4435 = vst [vmem:[%s6955_s14 + $0x10] sm:$0xff] %v4403_v60  ;;  %v4404_v53 = vadd.f32 %v5810_v7, %v4286_v36  ;;  %v5824_v60 = vld [vmem:[%s6238_s22 + $0x90] sm:$0xff] }
 0x349   : > { %4433 = vst [vmem:[%s6955_s14] sm:$0xff] %v4401_v54  ;;  %v4402_v29 = vadd.f32 %v5811_v5, %v4278_v39  ;;  %v5825_v54 = vld [vmem:[%s6238_s22 + $0x80] sm:$0xff] }
 0x34a   : > { %4436 = vst [vmem:[%s6955_s14 + $0x18] sm:$0xff] %v4404_v53  ;;  %v5826_v53 = vld [vmem:[%s6238_s22 + $0x98] sm:$0xff] }
 0x34b   : > { %4434 = vst [vmem:[%s6955_s14 + $0x8] sm:$0xff] %v4402_v29  ;;  %v5371_v28 = vpop.f32.mrb[36].mxu1  ;;  %v5827_v29 = vld [vmem:[%s6238_s22 + $0x88] sm:$0xff] }
 0x34c   : > { %v4299_v37 = vadd.f32 %v5371_v28, %v6945_v35  ;;  %v4290_v22 = vpop.f32.mrb[37].mxu1 }
 0x34d   : > { %v4291_v40 = vadd.f32 %v6945_v35, %v4290_v22  ;;  %v5372_v63 = vpop.f32.mrb[38].mxu1 }
 0x34e   : > { %v4407_v9 = vadd.f32 %v5812_v47, %v4299_v37  ;;  %v4302_v12 = vadd.f32 %v5372_v63, %v6945_v35  ;;  %v4293_v24 = vpop.f32.mrb[39].mxu1 }
 0x34f   : > { %v4405_v49 = vadd.f32 %v5813_v26, %v4291_v40  ;;  %v4294_v43 = vadd.f32 %v6945_v35, %v4293_v24 }
 0x350   : > { %4439 = vst [vmem:[%s6955_s14 + $0x30] sm:$0xff] %v4407_v9  ;;  %v4408_v57 = vadd.f32 %v5814_v34, %v4302_v12  ;;  %v5828_v9 = vld [vmem:[%s6238_s22 + $0xb0] sm:$0xff] }
 0x351   : > { %4437 = vst [vmem:[%s6955_s14 + $0x20] sm:$0xff] %v4405_v49  ;;  %v4406_v56 = vadd.f32 %v5815_v59, %v4294_v43  ;;  %v5829_v49 = vld [vmem:[%s6238_s22 + $0xa0] sm:$0xff] }
 0x352   : > { %4440 = vst [vmem:[%s6955_s14 + $0x38] sm:$0xff] %v4408_v57  ;;  %v5830_v57 = vld [vmem:[%s6238_s22 + $0xb8] sm:$0xff] }
 0x353   : > { %4438 = vst [vmem:[%s6955_s14 + $0x28] sm:$0xff] %v4406_v56  ;;  %v5375_v62 = vpop.f32.mrb[40].mxu1  ;;  %v5831_v56 = vld [vmem:[%s6238_s22 + $0xa8] sm:$0xff] }
 0x354   : > { %v4315_v17 = vadd.f32 %v5375_v62, %v6945_v35  ;;  %v4306_v33 = vpop.f32.mrb[41].mxu1 }
 0x355   : > { %v4307_v45 = vadd.f32 %v6945_v35, %v4306_v33  ;;  %v5376_v21 = vpop.f32.mrb[42].mxu1 }
 0x356   : > { %v4411_v6 = vadd.f32 %v5816_v15, %v4315_v17  ;;  %v4318_v11 = vadd.f32 %v5376_v21, %v6945_v35  ;;  %v4309_v30 = vpop.f32.mrb[43].mxu1 }
 0x357   : > { %v4409_v48 = vadd.f32 %v5817_v52, %v4307_v45  ;;  %v4310_v16 = vadd.f32 %v6945_v35, %v4309_v30 }
 0x358   : > { %4443 = vst [vmem:[%s6955_s14 + $0x50] sm:$0xff] %v4411_v6  ;;  %v4412_v2 = vadd.f32 %v5818_v25, %v4318_v11  ;;  %v5832_v6 = vld [vmem:[%s6238_s22 + $0xd0] sm:$0xff] }
 0x359   : > { %4441 = vst [vmem:[%s6955_s14 + $0x40] sm:$0xff] %v4409_v48  ;;  %v4410_v3 = vadd.f32 %v5819_v55, %v4310_v16  ;;  %v5833_v48 = vld [vmem:[%s6238_s22 + $0xc0] sm:$0xff] }
 0x35a   : > { %4444 = vst [vmem:[%s6955_s14 + $0x58] sm:$0xff] %v4412_v2  ;;  %v5834_v2 = vld [vmem:[%s6238_s22 + $0xd8] sm:$0xff] }
 0x35b   : > { %4442 = vst [vmem:[%s6955_s14 + $0x48] sm:$0xff] %v4410_v3  ;;  %v5379_v13 = vpop.f32.mrb[44].mxu1  ;;  %v5835_v3 = vld [vmem:[%s6238_s22 + $0xc8] sm:$0xff] }
 0x35c   : > { %v4331_v23 = vadd.f32 %v5379_v13, %v6945_v35  ;;  %v4322_v31 = vpop.f32.mrb[45].mxu1 }
 0x35d   : > { %v4323_v61 = vadd.f32 %v6945_v35, %v4322_v31  ;;  %v5380_v0 = vpop.f32.mrb[46].mxu1 }
 0x35e   : > { %v4415_v10 = vadd.f32 %v5820_v32, %v4331_v23  ;;  %v4334_v42 = vadd.f32 %v5380_v0, %v6945_v35  ;;  %v4325_v46 = vpop.f32.mrb[47].mxu1 }
 0x35f   : > { %v4413_v58 = vadd.f32 %v5821_v19, %v4323_v61  ;;  %v4326_v41 = vadd.f32 %v6945_v35, %v4325_v46 }
 0x360   : > { %4447 = vst [vmem:[%s6955_s14 + $0x70] sm:$0xff] %v4415_v10  ;;  %v4416_v38 = vadd.f32 %v5822_v20, %v4334_v42  ;;  %v5836_v10 = vld [vmem:[%s6238_s22 + $0xf0] sm:$0xff] }
 0x361   : > { %4445 = vst [vmem:[%s6955_s14 + $0x60] sm:$0xff] %v4413_v58  ;;  %v4414_v8 = vadd.f32 %v5823_v51, %v4326_v41  ;;  %v5837_v58 = vld [vmem:[%s6238_s22 + $0xe0] sm:$0xff] }
 0x362   : > { %4448 = vst [vmem:[%s6955_s14 + $0x78] sm:$0xff] %v4416_v38  ;;  %v5838_v38 = vld [vmem:[%s6238_s22 + $0xf8] sm:$0xff] }
 0x363   : > { %4446 = vst [vmem:[%s6955_s14 + $0x68] sm:$0xff] %v4414_v8  ;;  %v5383_v18 = vpop.f32.mrb[48].mxu1  ;;  %v5839_v8 = vld [vmem:[%s6238_s22 + $0xe8] sm:$0xff] }
 0x364   : > { %v4347_v4 = vadd.f32 %v5383_v18, %v6945_v35  ;;  %v4338_v50 = vpop.f32.mrb[49].mxu1 }
 0x365   : > { %v4339_v44 = vadd.f32 %v6945_v35, %v4338_v50  ;;  %v5384_v1 = vpop.f32.mrb[50].mxu1 }
 0x366   : > { %v4419_v36 = vadd.f32 %v5824_v60, %v4347_v4  ;;  %v4350_v14 = vadd.f32 %v5384_v1, %v6945_v35  ;;  %v4341_v27 = vpop.f32.mrb[51].mxu1 }
 0x367   : > { %v4417_v39 = vadd.f32 %v5825_v54, %v4339_v44  ;;  %v4342_v7 = vadd.f32 %v6945_v35, %v4341_v27 }
 0x368   : > { %4451 = vst [vmem:[%s6955_s14 + $0x90] sm:$0xff] %v4419_v36  ;;  %v4420_v5 = vadd.f32 %v5826_v53, %v4350_v14 }
 0x369   : > { %4449 = vst [vmem:[%s6955_s14 + $0x80] sm:$0xff] %v4417_v39  ;;  %v4418_v28 = vadd.f32 %v5827_v29, %v4342_v7 }
 0x36a   : > { %4452 = vst [vmem:[%s6955_s14 + $0x98] sm:$0xff] %v4420_v5 }
 0x36b   : > { %4450 = vst [vmem:[%s6955_s14 + $0x88] sm:$0xff] %v4418_v28  ;;  %v5387_v37 = vpop.f32.mrb[52].mxu1 }
 0x36c   : > { %v4363_v22 = vadd.f32 %v5387_v37, %v6945_v35  ;;  %v4354_v40 = vpop.f32.mrb[53].mxu1 }
 0x36d   : > { %v4355_v63 = vadd.f32 %v6945_v35, %v4354_v40  ;;  %v5388_v47 = vpop.f32.mrb[54].mxu1 }
 0x36e   : > { %v4423_v12 = vadd.f32 %v5828_v9, %v4363_v22  ;;  %v4366_v24 = vadd.f32 %v5388_v47, %v6945_v35  ;;  %v4357_v26 = vpop.f32.mrb[55].mxu1 }
 0x36f   : > { %v4421_v43 = vadd.f32 %v5829_v49, %v4355_v63  ;;  %v4358_v34 = vadd.f32 %v6945_v35, %v4357_v26 }
 0x370   : > { %4455 = vst [vmem:[%s6955_s14 + $0xb0] sm:$0xff] %v4423_v12  ;;  %v4424_v59 = vadd.f32 %v5830_v57, %v4366_v24 }
 0x371   : > { %4453 = vst [vmem:[%s6955_s14 + $0xa0] sm:$0xff] %v4421_v43  ;;  %v4422_v62 = vadd.f32 %v5831_v56, %v4358_v34 }
 0x372   : > { %4456 = vst [vmem:[%s6955_s14 + $0xb8] sm:$0xff] %v4424_v59 }
 0x373   : > { %4454 = vst [vmem:[%s6955_s14 + $0xa8] sm:$0xff] %v4422_v62  ;;  %v5391_v17 = vpop.f32.mrb[56].mxu1 }
 0x374   : > { %v4379_v33 = vadd.f32 %v5391_v17, %v6945_v35  ;;  %v4370_v45 = vpop.f32.mrb[57].mxu1 }
 0x375   : > { %v4371_v21 = vadd.f32 %v6945_v35, %v4370_v45  ;;  %v5392_v15 = vpop.f32.mrb[58].mxu1 }
 0x376   : > { %v4427_v11 = vadd.f32 %v5832_v6, %v4379_v33  ;;  %v4382_v30 = vadd.f32 %v5392_v15, %v6945_v35  ;;  %v4373_v52 = vpop.f32.mrb[59].mxu1 }
 0x377   : > { %v4425_v16 = vadd.f32 %v5833_v48, %v4371_v21  ;;  %v4374_v25 = vadd.f32 %v6945_v35, %v4373_v52 }
 0x378   : > { %4459 = vst [vmem:[%s6955_s14 + $0xd0] sm:$0xff] %v4427_v11  ;;  %v4428_v55 = vadd.f32 %v5834_v2, %v4382_v30 }
 0x379   : > { %4457 = vst [vmem:[%s6955_s14 + $0xc0] sm:$0xff] %v4425_v16  ;;  %v4426_v13 = vadd.f32 %v5835_v3, %v4374_v25 }
 0x37a   : > { %4460 = vst [vmem:[%s6955_s14 + $0xd8] sm:$0xff] %v4428_v55 }
 0x37b   : > { %4458 = vst [vmem:[%s6955_s14 + $0xc8] sm:$0xff] %v4426_v13  ;;  %v5395_v23 = vpop.f32.mrb[60].mxu1 }
 0x37c   : > { %v4395_v31 = vadd.f32 %v5395_v23, %v6945_v35  ;;  %v4386_v61 = vpop.f32.mrb[61].mxu1 }
 0x37d   : > { %v4387_v0 = vadd.f32 %v6945_v35, %v4386_v61  ;;  %v5396_v32 = vpop.f32.mrb[62].mxu1 }
 0x37e   : > { %v4431_v42 = vadd.f32 %v5836_v10, %v4395_v31  ;;  %v4398_v46 = vadd.f32 %v5396_v32, %v6945_v35  ;;  %v4389_v19 = vpop.f32.mrb[63].mxu1 }
 0x37f   : > { %v4429_v41 = vadd.f32 %v5837_v58, %v4387_v0  ;;  %v4390_v20 = vadd.f32 %v6945_v35, %v4389_v19 }
 0x380   : > { %4463 = vst [vmem:[%s6955_s14 + $0xf0] sm:$0xff] %v4431_v42  ;;  %v4432_v51 = vadd.f32 %v5838_v38, %v4398_v46 }
 0x381   : > { %4461 = vst [vmem:[%s6955_s14 + $0xe0] sm:$0xff] %v4429_v41  ;;  %v4430_v18 = vadd.f32 %v5839_v8, %v4390_v20 }
 0x382   : > { %4464 = vst [vmem:[%s6955_s14 + $0xf8] sm:$0xff] %v4432_v51 }
 0x383   : > { %4462 = vst [vmem:[%s6955_s14 + $0xe8] sm:$0xff] %v4430_v18 }
 0x384   : > { %5939 = shalt.err (!%p5936_p2)
}
 0x385   : > { %s5940_s22 = scalar_lea.hbm %s7048_s13, 4096  ;;  %s5944_s28 = scalar_lea.hbm %s7107_s9, 8192 }
 0x386   : > { %p5941_p13 = scmp.ne.s32.totalorder %s7048_s13, %s5940_s22  ;;  %p5945_p4 = scmp.lt.u32.totalorder %s7048_s13, %s7107_s9 }
 0x387   : > { %p5946_p5 = scmp.lt.u32.totalorder %s5944_s28, %s5940_s22  ;;  %p5948_p11 = scmp.lt.u32.totalorder %s5940_s22, %s7048_s13 }
 0x388   : > { %p5942_p6 = pnand %p5941_p13, %p7123_p0 }
 0x389   : > { %p5947_p8 = por %p5946_p5, %p5945_p4 }
 0x38a   : > { %p5943_p10 = pneg %p5942_p6 }
 0x38b   : > { %p5949_p1 = por %p5948_p11, %p5947_p8 }
 0x38d   : > { %p5950_p3 = pnand %p5949_p1, %p5943_p10 }
 0x38f   : > { %5953 = shalt.err (!%p5950_p3)
}
 0x390   : > { %s6008_s25 = smov 128   ;;  %s6009_s18 = smov 8  }
 0x391   : > { %5663 = dma.vmem_to_hbm [thread:$0]  (%p7123_p0), %s7050_s16, 4096, %s7048_s13, %s4466_s21, %s6008_s25, %s6008_s25, %s6009_s18  }
 0x392 PF: > { %s7124_s29 = sld [smem:[#allocation14_spill]]  ;;  %s4494_s15 = sand.u32 1, %s5984_s30  }
 0x393   : > { %p7126_p9 = scmp.ge.s32.totalorder %s5996_s12, 2  ;;  %s4495_s22 = scalar_lea.sflag [#allocation6], %s4494_s15 }
 0x398   : > { %p7125_p7 = scmp.ne.s32.totalorder %s7124_s29, 0 }
 0x39a   : > { %p5677_p12 = pnand %p7126_p9, %p7125_p7 }
 0x39c   : > { %5979 = dma.done.wait (!%p5677_p12), %s4495_s22, 4096  }
 0x39d   : > { %5981 = vsyncadd (!%p5677_p12), %s4495_s22, 4294963200  ;;  %p23_p2 = scmp.ge.s32.totalorder %s6170_s24, 4   ;;  %s7127_s30 = smov %s5988_s10 }
 0x39e   : > { %s7128_s10 = smov %s5992_s11  ;;  %s7129_s11 = smov %s6186_s27 }
 0x39f   : > { %s7130_s12 = smov %s6170_s24  ;;  %25 = sbr.rel (!%p23_p2) target bundleno = 6 (0x6), region = 119 }
 0x3a6   :  { %4500 = vsyncpa [#allocation5], 1 }
 0x3a7   :  { %4502 = vsyncpa [#allocation5 + $0x1], 1 }
 0x3a8   :  { %4503 = vsyncpa [#allocation8], 1 }
 0x3a9   :  { %4504 = vsyncpa [#allocation6], 1 }
 0x3aa   :  { %4506 = vsyncpa [#allocation6 + $0x1], 1 }

</bundles_post_ra>
